<compile_context>
chip_gen: v7x
topology: tpu7x:2x2x1
jax: 0.10.0
libtpu: 0.0.40
codegen_flags: <defaults>
</compile_context>

<pallas_src>
import jax
import jax.numpy as jnp
from jax.experimental import pallas as pl
from jax.experimental.pallas import tpu as pltpu

# ---------------- configuration (small synthetic shapes) ----------------
IN_CHANNELS = 8        # N  (per-part channels)
REF_EMBED_DIM = 16     # D
TO_CHANNELS = 32       # O
HIDDEN_CHANNELS = 16   # P
KERNEL_Q = 3           # depthwise_conv kernel size (full conv in the module)
NUM_STACKS = 2         # num_tcn_stacks
NUM_BLOCKS = 2         # TCN blocks per stack (first block sees the embedding)
N_PARTS = 3
TIME = 128             # K (time / feature length)
BATCH = 2
EPS_LN = 1e-5
EPS_GLN = 1e-5

C3 = N_PARTS * IN_CHANNELS
NB = NUM_STACKS * NUM_BLOCKS


def _dilations():
    out = []
    for _s in range(NUM_STACKS):
        for b in range(NUM_BLOCKS):
            out.append(1 if b == 0 else 2 ** b)
    return out


DILATIONS = _dilations()

# ----------------- packed "vector slab" layout (one VMEM buffer) -----------------
VROWS = max(TO_CHANNELS, C3, HIDDEN_CHANNELS, 2 * NB)   # 32
COL_LN_W = 0      # rows 0:C3
COL_LN_B = 1      # rows 0:C3
COL_CONV_B = 2    # rows 0:O
COL_MB = 3        # rows 0:3N (fused mask bias)
COL_ALPHA = 4     # rows 0:NB = a1[j], rows NB:2NB = a2[j]
COL_BLOCK0 = 5
VECS_PER_BLOCK = 7  # per block j: c1b, g1w, g1b, db, g2w, g2b, c2b
N_VCOLS = COL_BLOCK0 + NB * VECS_PER_BLOCK  # 33


# ---------------------------- Pallas kernel ----------------------------
def speaker_extractor_kernel(
    e_ref, ep_ref, spk_ref,
    conv_w_ref, c1wx_ref, c1wd_ref, dwf_ref, c2w_ref, mwf_ref, vslab_ref,
    s_ref,
):
    f32 = jnp.float32
    e = e_ref[0].astype(f32)      # (3N, T)
    spk = spk_ref[0].astype(f32)  # (D, 1)
    vslab = vslab_ref[...]        # (VROWS, N_VCOLS)

    def vcol(idx, c):             # (c, 1) column vector, static slice
        return vslab[0:c, idx:idx + 1]

    def alpha(row):               # scalar PReLU slope as (1, 1)
        return vslab[row:row + 1, COL_ALPHA:COL_ALPHA + 1]

    def dot(a, b):
        return jnp.dot(a, b, preferred_element_type=f32)

    def prelu(y, a):
        return jnp.where(y >= 0, y, a * y)

    def gln(y, w, b):
        # GlobalLayerNorm over (channels, time); single-pass stats in f32.
        inv_n = 1.0 / (y.shape[0] * y.shape[1])
        s1 = jnp.sum(y) * inv_n
        s2 = jnp.sum(y * y) * inv_n
        v = s2 - s1 * s1
        return (y - s1) * jax.lax.rsqrt(v + EPS_GLN) * w + b

    # ---- speaker-embedding projections for all stacks (off the serial chain) ----
    spk_proj = dot(c1wd_ref[...], spk)            # (S*P, 1)

    # ---- ChannelLayerNorm: normalize over channels per time step ----
    m = jnp.mean(e, axis=0, keepdims=True)
    msq = jnp.mean(e * e, axis=0, keepdims=True)
    x = (e - m) * jax.lax.rsqrt(msq - m * m + EPS_LN)
    x = x * vcol(COL_LN_W, C3) + vcol(COL_LN_B, C3)

    # ---- 1x1 conv: (3N -> O) ----
    x = dot(conv_w_ref[...], x) + vcol(COL_CONV_B, TO_CHANNELS)   # (O, T)

    iota_t = jax.lax.broadcasted_iota(jnp.int32, (HIDDEN_CHANNELS, TIME), 1)

    # ---- TCN stacks ----
    j = 0
    for s in range(NUM_STACKS):
        for bidx in range(NUM_BLOCKS):
            d = DILATIONS[j]
            base = COL_BLOCK0 + j * VECS_PER_BLOCK

            # conv1 (1x1); block 0 of each stack adds the speaker-embed bias
            y = dot(c1wx_ref[j], x) + vcol(base + 0, HIDDEN_CHANNELS)
            if bidx == 0:
                y = y + spk_proj[s * HIDDEN_CHANNELS:(s + 1) * HIDDEN_CHANNELS, :]
            y = prelu(y, alpha(j))
            y = gln(y, vcol(base + 1, HIDDEN_CHANNELS), vcol(base + 2, HIDDEN_CHANNELS))

            # dilated k=3 conv as ONE fused matmul: (P, 3P) @ (3P, T)
            y_m = jnp.where(iota_t >= d,
                            pltpu.roll(y, shift=d, axis=1), 0.0)        # y[t - d]
            y_p = jnp.where(iota_t < TIME - d,
                            pltpu.roll(y, shift=TIME - d, axis=1), 0.0)  # y[t + d]
            y_stack = jnp.concatenate([y_m, y, y_p], axis=0)             # (3P, T)
            z = dot(dwf_ref[j], y_stack) + vcol(base + 3, HIDDEN_CHANNELS)
            z = prelu(z, alpha(NB + j))
            z = gln(z, vcol(base + 4, HIDDEN_CHANNELS), vcol(base + 5, HIDDEN_CHANNELS))

            # conv2 (1x1) back to O channels + residual
            x = x + dot(c2w_ref[j], z) + vcol(base + 6, TO_CHANNELS)
            j += 1

    # ---- fused mask convs + ReLU + elementwise multiply with e_parts ----
    mask = jnp.maximum(dot(mwf_ref[...], x) + vcol(COL_MB, C3), 0.0)     # (3N, T)
    s_ref[0] = (mask * ep_ref[0].astype(f32)).astype(s_ref.dtype)


# ------------------------------ wrapper ------------------------------
def _full_spec(a):
    nd = a.ndim
    # Constant block index: the pipeliner does not re-DMA parameters between
    # consecutive grid steps when the block index is unchanged.
    return pl.BlockSpec(a.shape, lambda b, _nd=nd: (0,) * _nd)


def _pack_vslab(p):
    def col(v):
        v = jnp.asarray(v, jnp.float32).reshape(-1)
        return jnp.pad(v, (0, VROWS - v.shape[0]))

    cols = [None] * N_VCOLS
    cols[COL_LN_W] = col(p["ln_w"])
    cols[COL_LN_B] = col(p["ln_b"])
    cols[COL_CONV_B] = col(p["conv_b"])
    cols[COL_MB] = col(p["mb"])
    cols[COL_ALPHA] = col(jnp.concatenate([p["a1"].reshape(-1), p["a2"].reshape(-1)]))
    for j in range(NB):
        base = COL_BLOCK0 + j * VECS_PER_BLOCK
        cols[base + 0] = col(p["c1b"][j])
        cols[base + 1] = col(p["g1w"][j])
        cols[base + 2] = col(p["g1b"][j])
        cols[base + 3] = col(p["db"][j])
        cols[base + 4] = col(p["g2w"][j])
        cols[base + 5] = col(p["g2b"][j])
        cols[base + 6] = col(p["c2b"][j])
    return jnp.stack(cols, axis=1)                         # (VROWS, N_VCOLS)


def speaker_extractor(e, e1, e2, e3, ref_embed, params):
    B = e.shape[0]
    f32 = jnp.float32

    # Layout plumbing (done once in the wrapper, not per kernel step):
    spk = ref_embed[:, :, None].astype(f32)                # (B, D, 1)
    ep = jnp.concatenate([e1, e2, e3], axis=1).astype(f32)  # (B, 3N, T)
    conv_w = params["conv_w"].astype(f32)                  # (O, 3N)
    c1wx = params["c1wx"].astype(f32)                      # (NB, P, O)
    c1wd_flat = params["c1wd"].reshape(
        NUM_STACKS * HIDDEN_CHANNELS, REF_EMBED_DIM).astype(f32)
    dwf = jnp.transpose(params["dw"], (0, 2, 1, 3)).reshape(
        NB, HIDDEN_CHANNELS, KERNEL_Q * HIDDEN_CHANNELS).astype(f32)  # (NB, P, 3P)
    c2w = params["c2w"].astype(f32)                        # (NB, O, P)
    mwf = params["mw"].reshape(N_PARTS * IN_CHANNELS, TO_CHANNELS).astype(f32)
    vslab = _pack_vslab(params)

    weights = [conv_w, c1wx, c1wd_flat, dwf, c2w, mwf, vslab]

    in_specs = [
        pl.BlockSpec((1, C3, TIME), lambda b: (b, 0, 0)),            # e
        pl.BlockSpec((1, C3, TIME), lambda b: (b, 0, 0)),            # e_parts (fused)
        pl.BlockSpec((1, REF_EMBED_DIM, 1), lambda b: (b, 0, 0)),    # spk
    ] + [_full_spec(a) for a in weights]

    out_specs = pl.BlockSpec((1, C3, TIME), lambda b: (b, 0, 0))
    out_shape = jax.ShapeDtypeStruct((B, C3, TIME), jnp.float32)

    f = pl.pallas_call(
        speaker_extractor_kernel,
        out_shape=out_shape,
        grid_spec=pltpu.PrefetchScalarGridSpec(
            num_scalar_prefetch=0,
            grid=(B,),
            in_specs=in_specs,
            out_specs=out_specs,
        ),
        compiler_params=pltpu.CompilerParams(
            dimension_semantics=("parallel",)),   # batch shards across TCs on v7x
    )
    s_all = f(e.astype(f32), ep, spk, *weights)

    n = IN_CHANNELS
    return {"s1": s_all[:, 0:n], "s2": s_all[:, n:2 * n], "s3": s_all[:, 2 * n:3 * n]}


# -------------------- deterministic parameter init --------------------
def init_params(key):
    keys = iter(jax.random.split(key, 64))

    def nrm(shape, scale=0.1):
        return (scale * jax.random.normal(next(keys), shape)).astype(jnp.float32)

    p = {}
    p["ln_w"] = 1.0 + nrm((C3, 1), 0.05)
    p["ln_b"] = nrm((C3, 1), 0.05)
    p["conv_w"] = nrm((TO_CHANNELS, C3))
    p["conv_b"] = nrm((TO_CHANNELS, 1), 0.05)
    p["c1wx"] = nrm((NB, HIDDEN_CHANNELS, TO_CHANNELS))
    p["c1wd"] = nrm((NUM_STACKS, HIDDEN_CHANNELS, REF_EMBED_DIM))
    p["c1b"] = nrm((NB, HIDDEN_CHANNELS, 1), 0.05)
    p["a1"] = jnp.full((NB, 1, 1), 0.25, jnp.float32)   # PReLU default init
    p["g1w"] = 1.0 + nrm((NB, HIDDEN_CHANNELS, 1), 0.05)
    p["g1b"] = nrm((NB, HIDDEN_CHANNELS, 1), 0.05)
    p["dw"] = nrm((NB, KERNEL_Q, HIDDEN_CHANNELS, HIDDEN_CHANNELS))
    p["db"] = nrm((NB, HIDDEN_CHANNELS, 1), 0.05)
    p["a2"] = jnp.full((NB, 1, 1), 0.25, jnp.float32)
    p["g2w"] = 1.0 + nrm((NB, HIDDEN_CHANNELS, 1), 0.05)
    p["g2b"] = nrm((NB, HIDDEN_CHANNELS, 1), 0.05)
    p["c2w"] = nrm((NB, TO_CHANNELS, HIDDEN_CHANNELS))
    p["c2b"] = nrm((NB, TO_CHANNELS, 1), 0.05)
    p["mw"] = nrm((N_PARTS, IN_CHANNELS, TO_CHANNELS))
    p["mb"] = nrm((N_PARTS, IN_CHANNELS, 1), 0.05)
    return p


# ---------------------- pure-JAX reference (checks) ----------------------
def _reference_single(e, e1, e2, e3, spk, p):
    hp = jax.lax.Precision.HIGHEST

    def dot(a, b):
        return jnp.dot(a, b, precision=hp)

    mean = e.mean(0, keepdims=True)
    var = ((e - mean) ** 2).mean(0, keepdims=True)
    x = (e - mean) / jnp.sqrt(var + EPS_LN) * p["ln_w"] + p["ln_b"]
    x = dot(p["conv_w"], x) + p["conv_b"]

    j = 0
    for s in range(NUM_STACKS):
        for bidx in range(NUM_BLOCKS):
            d = DILATIONS[j]
            y = dot(p["c1wx"][j], x) + p["c1b"][j]
            if bidx == 0:
                y = y + dot(p["c1wd"][s], spk[:, None])
            y = jnp.where(y >= 0, y, p["a1"][j] * y)
            m = y.mean(); v = ((y - m) ** 2).mean()
            y = (y - m) / jnp.sqrt(v + EPS_GLN) * p["g1w"][j] + p["g1b"][j]
            zeros = jnp.zeros((HIDDEN_CHANNELS, d), jnp.float32)
            y_m = jnp.concatenate([zeros, y[:, : TIME - d]], axis=1)
            y_p = jnp.concatenate([y[:, d:], zeros], axis=1)
            z = (dot(p["dw"][j, 0], y_m) + dot(p["dw"][j, 1], y)
                 + dot(p["dw"][j, 2], y_p) + p["db"][j])
            z = jnp.where(z >= 0, z, p["a2"][j] * z)
            m = z.mean(); v = ((z - m) ** 2).mean()
            z = (z - m) / jnp.sqrt(v + EPS_GLN) * p["g2w"][j] + p["g2b"][j]
            x = x + dot(p["c2w"][j], z) + p["c2b"][j]
            j += 1

    outs = []
    for i, ep in enumerate((e1, e2, e3)):
        mask = jnp.maximum(dot(p["mw"][i], x) + p["mb"][i], 0.0)
        outs.append(mask * ep)
    return tuple(outs)


def reference(e, e1, e2, e3, ref_embed, p):
    fn = lambda a, b, c, d, s: _reference_single(a, b, c, d, s, p)
    return jax.vmap(fn)(e, e1, e2, e3, ref_embed)


# -------------------------------- main --------------------------------
if __name__ == "__main__":
    key = jax.random.PRNGKey(0)
    k_e, k_e1, k_e2, k_e3, k_ref, k_p = jax.random.split(key, 6)

    e = jax.random.normal(k_e, (BATCH, C3, TIME), jnp.float32)
    e1 = jax.random.normal(k_e1, (BATCH, IN_CHANNELS, TIME), jnp.float32)
    e2 = jax.random.normal(k_e2, (BATCH, IN_CHANNELS, TIME), jnp.float32)
    e3 = jax.random.normal(k_e3, (BATCH, IN_CHANNELS, TIME), jnp.float32)
    ref_embed = jax.random.normal(k_ref, (BATCH, REF_EMBED_DIM), jnp.float32)
    params = init_params(k_p)

    out = speaker_extractor(e, e1, e2, e3, ref_embed, params)
    jax.block_until_ready(out)

    ref_out = reference(e, e1, e2, e3, ref_embed, params)
    for i, name in enumerate(("s1", "s2", "s3")):
        assert jnp.allclose(out[name], ref_out[i], atol=2e-3, rtol=2e-3), name

    print("KERNEL_OK")
</pallas_src>

<mosaic_0001>
module attributes {stable_mosaic.version = 11 : i64} {
  func.func @speaker_extractor_kernel(%arg0: i32, %arg1: memref<1x24x128xf32, #tpu.memory_space<vmem>>, %arg2: memref<1x24x128xf32, #tpu.memory_space<vmem>>, %arg3: memref<1x16x1xf32, #tpu.memory_space<vmem>>, %arg4: memref<32x24xf32, #tpu.memory_space<vmem>>, %arg5: memref<4x16x32xf32, #tpu.memory_space<vmem>>, %arg6: memref<32x16xf32, #tpu.memory_space<vmem>>, %arg7: memref<4x16x48xf32, #tpu.memory_space<vmem>>, %arg8: memref<4x32x16xf32, #tpu.memory_space<vmem>>, %arg9: memref<24x32xf32, #tpu.memory_space<vmem>>, %arg10: memref<32x33xf32, #tpu.memory_space<vmem>>, %arg11: memref<1x24x128xf32, #tpu.memory_space<vmem>>) attributes {dimension_semantics = [#tpu.dimension_semantics<parallel>], iteration_bounds = array<i64: 2>, scalar_prefetch = 0 : i64, scratch_operands = 0 : i64, tpu.core_type = #tpu.core_type<tc>, window_params = [{transform_indices = @transform_0, window_bounds = array<i64: 1, 24, 128>}, {transform_indices = @transform_1, window_bounds = array<i64: 1, 24, 128>}, {transform_indices = @transform_2, window_bounds = array<i64: 1, 16, 1>}, {pipeline_mode = #tpu.pipeline_mode<synchronous>, transform_indices = @transform_3, window_bounds = array<i64: 32, 24>}, {pipeline_mode = #tpu.pipeline_mode<synchronous>, transform_indices = @transform_4, window_bounds = array<i64: 4, 16, 32>}, {pipeline_mode = #tpu.pipeline_mode<synchronous>, transform_indices = @transform_5, window_bounds = array<i64: 32, 16>}, {pipeline_mode = #tpu.pipeline_mode<synchronous>, transform_indices = @transform_6, window_bounds = array<i64: 4, 16, 48>}, {pipeline_mode = #tpu.pipeline_mode<synchronous>, transform_indices = @transform_7, window_bounds = array<i64: 4, 32, 16>}, {pipeline_mode = #tpu.pipeline_mode<synchronous>, transform_indices = @transform_8, window_bounds = array<i64: 24, 32>}, {pipeline_mode = #tpu.pipeline_mode<synchronous>, transform_indices = @transform_9, window_bounds = array<i64: 32, 33>}, {transform_indices = @transform_10, window_bounds = array<i64: 1, 24, 128>}]} {
    %c0 = arith.constant 0 : index
    %c0_0 = arith.constant 0 : index
    %c0_1 = arith.constant 0 : index
    %0 = vector.load %arg1[%c0, %c0_0, %c0_1] : memref<1x24x128xf32, #tpu.memory_space<vmem>>, vector<1x24x128xf32>
    %1 = vector.shape_cast %0 : vector<1x24x128xf32> to vector<24x128xf32>
    %c0_2 = arith.constant 0 : index
    %c0_3 = arith.constant 0 : index
    %c0_4 = arith.constant 0 : index
    %2 = vector.load %arg3[%c0_2, %c0_3, %c0_4] : memref<1x16x1xf32, #tpu.memory_space<vmem>>, vector<1x16x1xf32>
    %3 = vector.shape_cast %2 : vector<1x16x1xf32> to vector<16x1xf32>
    %c0_5 = arith.constant 0 : index
    %c0_6 = arith.constant 0 : index
    %4 = vector.load %arg10[%c0_5, %c0_6] : memref<32x33xf32, #tpu.memory_space<vmem>>, vector<32x33xf32>
    %c0_7 = arith.constant 0 : index
    %c0_8 = arith.constant 0 : index
    %5 = vector.load %arg6[%c0_7, %c0_8] : memref<32x16xf32, #tpu.memory_space<vmem>>, vector<32x16xf32>
    %cst = arith.constant dense<0.000000e+00> : vector<32x1xf32>
    %6 = tpu.matmul %5, %3, %cst {dimension_numbers = #tpu.dot_dimension_numbers<[1], [0], [0], [1], [0, 0, 1, 1], [], []>} : vector<32x16xf32>, vector<16x1xf32>, vector<32x1xf32> -> vector<32x1xf32>
    %cst_9 = arith.constant dense<0.000000e+00> : vector<128xf32>
    %7 = vector.multi_reduction <add>, %1, %cst_9 [0] : vector<24x128xf32> to vector<128xf32>
    %8 = vector.shape_cast %7 : vector<128xf32> to vector<1x128xf32>
    %cst_10 = arith.constant 2.400000e+01 : f32
    %9 = vector.broadcast %cst_10 : f32 to vector<1x128xf32>
    %10 = arith.divf %8, %9 : vector<1x128xf32>
    %11 = arith.mulf %1, %1 : vector<24x128xf32>
    %cst_11 = arith.constant dense<0.000000e+00> : vector<128xf32>
    %12 = vector.multi_reduction <add>, %11, %cst_11 [0] : vector<24x128xf32> to vector<128xf32>
    %13 = vector.shape_cast %12 : vector<128xf32> to vector<1x128xf32>
    %cst_12 = arith.constant 2.400000e+01 : f32
    %14 = vector.broadcast %cst_12 : f32 to vector<1x128xf32>
    %15 = arith.divf %13, %14 : vector<1x128xf32>
    %16 = vector.broadcast %10 : vector<1x128xf32> to vector<24x128xf32>
    %17 = arith.subf %1, %16 : vector<24x128xf32>
    %18 = arith.mulf %10, %10 : vector<1x128xf32>
    %19 = arith.subf %15, %18 : vector<1x128xf32>
    %cst_13 = arith.constant 9.99999974E-6 : f32
    %20 = vector.broadcast %cst_13 : f32 to vector<1x128xf32>
    %21 = arith.addf %19, %20 : vector<1x128xf32>
    %22 = math.rsqrt %21 : vector<1x128xf32>
    %23 = vector.broadcast %22 : vector<1x128xf32> to vector<24x128xf32>
    %24 = arith.mulf %17, %23 : vector<24x128xf32>
    %25 = vector.extract_strided_slice %4 {offsets = [0, 0], sizes = [24, 1], strides = [1, 1]} : vector<32x33xf32> to vector<24x1xf32>
    %26 = vector.broadcast %25 : vector<24x1xf32> to vector<24x128xf32>
    %27 = arith.mulf %24, %26 : vector<24x128xf32>
    %28 = vector.extract_strided_slice %4 {offsets = [0, 1], sizes = [24, 1], strides = [1, 1]} : vector<32x33xf32> to vector<24x1xf32>
    %29 = vector.broadcast %28 : vector<24x1xf32> to vector<24x128xf32>
    %30 = arith.addf %27, %29 : vector<24x128xf32>
    %c0_14 = arith.constant 0 : index
    %c0_15 = arith.constant 0 : index
    %31 = vector.load %arg4[%c0_14, %c0_15] : memref<32x24xf32, #tpu.memory_space<vmem>>, vector<32x24xf32>
    %cst_16 = arith.constant dense<0.000000e+00> : vector<32x128xf32>
    %32 = tpu.matmul %31, %30, %cst_16 {dimension_numbers = #tpu.dot_dimension_numbers<[1], [0], [0], [1], [0, 0, 1, 1], [], []>} : vector<32x24xf32>, vector<24x128xf32>, vector<32x128xf32> -> vector<32x128xf32>
    %33 = vector.extract_strided_slice %4 {offsets = [0, 2], sizes = [32, 1], strides = [1, 1]} : vector<32x33xf32> to vector<32x1xf32>
    %34 = vector.broadcast %33 : vector<32x1xf32> to vector<32x128xf32>
    %35 = arith.addf %32, %34 : vector<32x128xf32>
    %36 = tpu.iota {dimensions = array<i32: 1>} : vector<16x128xi32>
    %c0_17 = arith.constant 0 : index
    %c0_18 = arith.constant 0 : index
    %c0_19 = arith.constant 0 : index
    %37 = vector.load %arg5[%c0_17, %c0_18, %c0_19] : memref<4x16x32xf32, #tpu.memory_space<vmem>>, vector<1x16x32xf32>
    %38 = vector.shape_cast %37 : vector<1x16x32xf32> to vector<16x32xf32>
    %cst_20 = arith.constant dense<0.000000e+00> : vector<16x128xf32>
    %39 = tpu.matmul %38, %35, %cst_20 {dimension_numbers = #tpu.dot_dimension_numbers<[1], [0], [0], [1], [0, 0, 1, 1], [], []>} : vector<16x32xf32>, vector<32x128xf32>, vector<16x128xf32> -> vector<16x128xf32>
    %40 = vector.extract_strided_slice %4 {offsets = [0, 5], sizes = [16, 1], strides = [1, 1]} : vector<32x33xf32> to vector<16x1xf32>
    %41 = vector.broadcast %40 : vector<16x1xf32> to vector<16x128xf32>
    %42 = arith.addf %39, %41 : vector<16x128xf32>
    %43 = vector.extract_strided_slice %6 {offsets = [0, 0], sizes = [16, 1], strides = [1, 1]} : vector<32x1xf32> to vector<16x1xf32>
    %44 = vector.broadcast %43 : vector<16x1xf32> to vector<16x128xf32>
    %45 = arith.addf %42, %44 : vector<16x128xf32>
    %46 = vector.extract_strided_slice %4 {offsets = [0, 4], sizes = [1, 1], strides = [1, 1]} : vector<32x33xf32> to vector<1x1xf32>
    %cst_21 = arith.constant 0.000000e+00 : f32
    %47 = vector.broadcast %cst_21 : f32 to vector<16x128xf32>
    %48 = arith.cmpf oge, %45, %47 : vector<16x128xf32>
    %49 = vector.broadcast %46 : vector<1x1xf32> to vector<16x128xf32>
    %50 = arith.mulf %49, %45 : vector<16x128xf32>
    %51 = arith.select %48, %45, %50 : vector<16x128xi1>, vector<16x128xf32>
    %52 = vector.extract_strided_slice %4 {offsets = [0, 6], sizes = [16, 1], strides = [1, 1]} : vector<32x33xf32> to vector<16x1xf32>
    %53 = vector.extract_strided_slice %4 {offsets = [0, 7], sizes = [16, 1], strides = [1, 1]} : vector<32x33xf32> to vector<16x1xf32>
    %54 = vector.shape_cast %51 : vector<16x128xf32> to vector<1x16x128xf32>
    %cst_22 = arith.constant dense<0.000000e+00> : vector<1xf32>
    %55 = vector.multi_reduction <add>, %54, %cst_22 [1, 2] : vector<1x16x128xf32> to vector<1xf32>
    %56 = vector.shape_cast %55 : vector<1xf32> to vector<1x1x1xf32>
    %57 = vector.extract %56[0, 0, 0] : f32 from vector<1x1x1xf32>
    %cst_23 = arith.constant 4.8828125E-4 : f32
    %58 = arith.mulf %57, %cst_23 : f32
    %59 = arith.mulf %51, %51 : vector<16x128xf32>
    %60 = vector.shape_cast %59 : vector<16x128xf32> to vector<1x16x128xf32>
    %cst_24 = arith.constant dense<0.000000e+00> : vector<1xf32>
    %61 = vector.multi_reduction <add>, %60, %cst_24 [1, 2] : vector<1x16x128xf32> to vector<1xf32>
    %62 = vector.shape_cast %61 : vector<1xf32> to vector<1x1x1xf32>
    %63 = vector.extract %62[0, 0, 0] : f32 from vector<1x1x1xf32>
    %cst_25 = arith.constant 4.8828125E-4 : f32
    %64 = arith.mulf %63, %cst_25 : f32
    %65 = arith.mulf %58, %58 : f32
    %66 = arith.subf %64, %65 : f32
    %67 = vector.broadcast %58 : f32 to vector<16x128xf32>
    %68 = arith.subf %51, %67 : vector<16x128xf32>
    %cst_26 = arith.constant 9.99999974E-6 : f32
    %69 = arith.addf %66, %cst_26 : f32
    %70 = math.rsqrt %69 : f32
    %71 = vector.broadcast %70 : f32 to vector<16x128xf32>
    %72 = arith.mulf %68, %71 : vector<16x128xf32>
    %73 = vector.broadcast %52 : vector<16x1xf32> to vector<16x128xf32>
    %74 = arith.mulf %72, %73 : vector<16x128xf32>
    %75 = vector.broadcast %53 : vector<16x1xf32> to vector<16x128xf32>
    %76 = arith.addf %74, %75 : vector<16x128xf32>
    %c1_i32 = arith.constant 1 : i32
    %77 = vector.broadcast %c1_i32 : i32 to vector<16x128xi32>
    %78 = arith.cmpi sge, %36, %77 : vector<16x128xi32>
    %c1_i32_27 = arith.constant 1 : i32
    %79 = tpu.dynamic_rotate %76 by %c1_i32_27 dim 1 : vector<16x128xf32>, i32 -> vector<16x128xf32>
    %cst_28 = arith.constant 0.000000e+00 : f32
    %80 = vector.broadcast %cst_28 : f32 to vector<16x128xf32>
    %81 = arith.select %78, %79, %80 : vector<16x128xi1>, vector<16x128xf32>
    %c127_i32 = arith.constant 127 : i32
    %82 = vector.broadcast %c127_i32 : i32 to vector<16x128xi32>
    %83 = arith.cmpi slt, %36, %82 : vector<16x128xi32>
    %c127_i32_29 = arith.constant 127 : i32
    %84 = tpu.dynamic_rotate %76 by %c127_i32_29 dim 1 : vector<16x128xf32>, i32 -> vector<16x128xf32>
    %cst_30 = arith.constant 0.000000e+00 : f32
    %85 = vector.broadcast %cst_30 : f32 to vector<16x128xf32>
    %86 = arith.select %83, %84, %85 : vector<16x128xi1>, vector<16x128xf32>
    %87 = tpu.concatenate %81, %76, %86 in 0 : vector<16x128xf32>, vector<16x128xf32>, vector<16x128xf32> -> vector<48x128xf32>
    %c0_31 = arith.constant 0 : index
    %c0_32 = arith.constant 0 : index
    %c0_33 = arith.constant 0 : index
    %88 = vector.load %arg7[%c0_31, %c0_32, %c0_33] : memref<4x16x48xf32, #tpu.memory_space<vmem>>, vector<1x16x48xf32>
    %89 = vector.shape_cast %88 : vector<1x16x48xf32> to vector<16x48xf32>
    %cst_34 = arith.constant dense<0.000000e+00> : vector<16x128xf32>
    %90 = tpu.matmul %89, %87, %cst_34 {dimension_numbers = #tpu.dot_dimension_numbers<[1], [0], [0], [1], [0, 0, 1, 1], [], []>} : vector<16x48xf32>, vector<48x128xf32>, vector<16x128xf32> -> vector<16x128xf32>
    %91 = vector.extract_strided_slice %4 {offsets = [0, 8], sizes = [16, 1], strides = [1, 1]} : vector<32x33xf32> to vector<16x1xf32>
    %92 = vector.broadcast %91 : vector<16x1xf32> to vector<16x128xf32>
    %93 = arith.addf %90, %92 : vector<16x128xf32>
    %94 = vector.extract_strided_slice %4 {offsets = [4, 4], sizes = [1, 1], strides = [1, 1]} : vector<32x33xf32> to vector<1x1xf32>
    %cst_35 = arith.constant 0.000000e+00 : f32
    %95 = vector.broadcast %cst_35 : f32 to vector<16x128xf32>
    %96 = arith.cmpf oge, %93, %95 : vector<16x128xf32>
    %97 = vector.broadcast %94 : vector<1x1xf32> to vector<16x128xf32>
    %98 = arith.mulf %97, %93 : vector<16x128xf32>
    %99 = arith.select %96, %93, %98 : vector<16x128xi1>, vector<16x128xf32>
    %100 = vector.extract_strided_slice %4 {offsets = [0, 9], sizes = [16, 1], strides = [1, 1]} : vector<32x33xf32> to vector<16x1xf32>
    %101 = vector.extract_strided_slice %4 {offsets = [0, 10], sizes = [16, 1], strides = [1, 1]} : vector<32x33xf32> to vector<16x1xf32>
    %102 = vector.shape_cast %99 : vector<16x128xf32> to vector<1x16x128xf32>
    %cst_36 = arith.constant dense<0.000000e+00> : vector<1xf32>
    %103 = vector.multi_reduction <add>, %102, %cst_36 [1, 2] : vector<1x16x128xf32> to vector<1xf32>
    %104 = vector.shape_cast %103 : vector<1xf32> to vector<1x1x1xf32>
    %105 = vector.extract %104[0, 0, 0] : f32 from vector<1x1x1xf32>
    %cst_37 = arith.constant 4.8828125E-4 : f32
    %106 = arith.mulf %105, %cst_37 : f32
    %107 = arith.mulf %99, %99 : vector<16x128xf32>
    %108 = vector.shape_cast %107 : vector<16x128xf32> to vector<1x16x128xf32>
    %cst_38 = arith.constant dense<0.000000e+00> : vector<1xf32>
    %109 = vector.multi_reduction <add>, %108, %cst_38 [1, 2] : vector<1x16x128xf32> to vector<1xf32>
    %110 = vector.shape_cast %109 : vector<1xf32> to vector<1x1x1xf32>
    %111 = vector.extract %110[0, 0, 0] : f32 from vector<1x1x1xf32>
    %cst_39 = arith.constant 4.8828125E-4 : f32
    %112 = arith.mulf %111, %cst_39 : f32
    %113 = arith.mulf %106, %106 : f32
    %114 = arith.subf %112, %113 : f32
    %115 = vector.broadcast %106 : f32 to vector<16x128xf32>
    %116 = arith.subf %99, %115 : vector<16x128xf32>
    %cst_40 = arith.constant 9.99999974E-6 : f32
    %117 = arith.addf %114, %cst_40 : f32
    %118 = math.rsqrt %117 : f32
    %119 = vector.broadcast %118 : f32 to vector<16x128xf32>
    %120 = arith.mulf %116, %119 : vector<16x128xf32>
    %121 = vector.broadcast %100 : vector<16x1xf32> to vector<16x128xf32>
    %122 = arith.mulf %120, %121 : vector<16x128xf32>
    %123 = vector.broadcast %101 : vector<16x1xf32> to vector<16x128xf32>
    %124 = arith.addf %122, %123 : vector<16x128xf32>
    %c0_41 = arith.constant 0 : index
    %c0_42 = arith.constant 0 : index
    %c0_43 = arith.constant 0 : index
    %125 = vector.load %arg8[%c0_41, %c0_42, %c0_43] : memref<4x32x16xf32, #tpu.memory_space<vmem>>, vector<1x32x16xf32>
    %126 = vector.shape_cast %125 : vector<1x32x16xf32> to vector<32x16xf32>
    %cst_44 = arith.constant dense<0.000000e+00> : vector<32x128xf32>
    %127 = tpu.matmul %126, %124, %cst_44 {dimension_numbers = #tpu.dot_dimension_numbers<[1], [0], [0], [1], [0, 0, 1, 1], [], []>} : vector<32x16xf32>, vector<16x128xf32>, vector<32x128xf32> -> vector<32x128xf32>
    %128 = arith.addf %35, %127 : vector<32x128xf32>
    %129 = vector.extract_strided_slice %4 {offsets = [0, 11], sizes = [32, 1], strides = [1, 1]} : vector<32x33xf32> to vector<32x1xf32>
    %130 = vector.broadcast %129 : vector<32x1xf32> to vector<32x128xf32>
    %131 = arith.addf %128, %130 : vector<32x128xf32>
    %c1 = arith.constant 1 : index
    %c0_45 = arith.constant 0 : index
    %c0_46 = arith.constant 0 : index
    %132 = vector.load %arg5[%c1, %c0_45, %c0_46] : memref<4x16x32xf32, #tpu.memory_space<vmem>>, vector<1x16x32xf32>
    %133 = vector.shape_cast %132 : vector<1x16x32xf32> to vector<16x32xf32>
    %cst_47 = arith.constant dense<0.000000e+00> : vector<16x128xf32>
    %134 = tpu.matmul %133, %131, %cst_47 {dimension_numbers = #tpu.dot_dimension_numbers<[1], [0], [0], [1], [0, 0, 1, 1], [], []>} : vector<16x32xf32>, vector<32x128xf32>, vector<16x128xf32> -> vector<16x128xf32>
    %135 = vector.extract_strided_slice %4 {offsets = [0, 12], sizes = [16, 1], strides = [1, 1]} : vector<32x33xf32> to vector<16x1xf32>
    %136 = vector.broadcast %135 : vector<16x1xf32> to vector<16x128xf32>
    %137 = arith.addf %134, %136 : vector<16x128xf32>
    %138 = vector.extract_strided_slice %4 {offsets = [1, 4], sizes = [1, 1], strides = [1, 1]} : vector<32x33xf32> to vector<1x1xf32>
    %cst_48 = arith.constant 0.000000e+00 : f32
    %139 = vector.broadcast %cst_48 : f32 to vector<16x128xf32>
    %140 = arith.cmpf oge, %137, %139 : vector<16x128xf32>
    %141 = vector.broadcast %138 : vector<1x1xf32> to vector<16x128xf32>
    %142 = arith.mulf %141, %137 : vector<16x128xf32>
    %143 = arith.select %140, %137, %142 : vector<16x128xi1>, vector<16x128xf32>
    %144 = vector.extract_strided_slice %4 {offsets = [0, 13], sizes = [16, 1], strides = [1, 1]} : vector<32x33xf32> to vector<16x1xf32>
    %145 = vector.extract_strided_slice %4 {offsets = [0, 14], sizes = [16, 1], strides = [1, 1]} : vector<32x33xf32> to vector<16x1xf32>
    %146 = vector.shape_cast %143 : vector<16x128xf32> to vector<1x16x128xf32>
    %cst_49 = arith.constant dense<0.000000e+00> : vector<1xf32>
    %147 = vector.multi_reduction <add>, %146, %cst_49 [1, 2] : vector<1x16x128xf32> to vector<1xf32>
    %148 = vector.shape_cast %147 : vector<1xf32> to vector<1x1x1xf32>
    %149 = vector.extract %148[0, 0, 0] : f32 from vector<1x1x1xf32>
    %cst_50 = arith.constant 4.8828125E-4 : f32
    %150 = arith.mulf %149, %cst_50 : f32
    %151 = arith.mulf %143, %143 : vector<16x128xf32>
    %152 = vector.shape_cast %151 : vector<16x128xf32> to vector<1x16x128xf32>
    %cst_51 = arith.constant dense<0.000000e+00> : vector<1xf32>
    %153 = vector.multi_reduction <add>, %152, %cst_51 [1, 2] : vector<1x16x128xf32> to vector<1xf32>
    %154 = vector.shape_cast %153 : vector<1xf32> to vector<1x1x1xf32>
    %155 = vector.extract %154[0, 0, 0] : f32 from vector<1x1x1xf32>
    %cst_52 = arith.constant 4.8828125E-4 : f32
    %156 = arith.mulf %155, %cst_52 : f32
    %157 = arith.mulf %150, %150 : f32
    %158 = arith.subf %156, %157 : f32
    %159 = vector.broadcast %150 : f32 to vector<16x128xf32>
    %160 = arith.subf %143, %159 : vector<16x128xf32>
    %cst_53 = arith.constant 9.99999974E-6 : f32
    %161 = arith.addf %158, %cst_53 : f32
    %162 = math.rsqrt %161 : f32
    %163 = vector.broadcast %162 : f32 to vector<16x128xf32>
    %164 = arith.mulf %160, %163 : vector<16x128xf32>
    %165 = vector.broadcast %144 : vector<16x1xf32> to vector<16x128xf32>
    %166 = arith.mulf %164, %165 : vector<16x128xf32>
    %167 = vector.broadcast %145 : vector<16x1xf32> to vector<16x128xf32>
    %168 = arith.addf %166, %167 : vector<16x128xf32>
    %c2_i32 = arith.constant 2 : i32
    %169 = vector.broadcast %c2_i32 : i32 to vector<16x128xi32>
    %170 = arith.cmpi sge, %36, %169 : vector<16x128xi32>
    %c2_i32_54 = arith.constant 2 : i32
    %171 = tpu.dynamic_rotate %168 by %c2_i32_54 dim 1 : vector<16x128xf32>, i32 -> vector<16x128xf32>
    %cst_55 = arith.constant 0.000000e+00 : f32
    %172 = vector.broadcast %cst_55 : f32 to vector<16x128xf32>
    %173 = arith.select %170, %171, %172 : vector<16x128xi1>, vector<16x128xf32>
    %c126_i32 = arith.constant 126 : i32
    %174 = vector.broadcast %c126_i32 : i32 to vector<16x128xi32>
    %175 = arith.cmpi slt, %36, %174 : vector<16x128xi32>
    %c126_i32_56 = arith.constant 126 : i32
    %176 = tpu.dynamic_rotate %168 by %c126_i32_56 dim 1 : vector<16x128xf32>, i32 -> vector<16x128xf32>
    %cst_57 = arith.constant 0.000000e+00 : f32
    %177 = vector.broadcast %cst_57 : f32 to vector<16x128xf32>
    %178 = arith.select %175, %176, %177 : vector<16x128xi1>, vector<16x128xf32>
    %179 = tpu.concatenate %173, %168, %178 in 0 : vector<16x128xf32>, vector<16x128xf32>, vector<16x128xf32> -> vector<48x128xf32>
    %c1_58 = arith.constant 1 : index
    %c0_59 = arith.constant 0 : index
    %c0_60 = arith.constant 0 : index
    %180 = vector.load %arg7[%c1_58, %c0_59, %c0_60] : memref<4x16x48xf32, #tpu.memory_space<vmem>>, vector<1x16x48xf32>
    %181 = vector.shape_cast %180 : vector<1x16x48xf32> to vector<16x48xf32>
    %cst_61 = arith.constant dense<0.000000e+00> : vector<16x128xf32>
    %182 = tpu.matmul %181, %179, %cst_61 {dimension_numbers = #tpu.dot_dimension_numbers<[1], [0], [0], [1], [0, 0, 1, 1], [], []>} : vector<16x48xf32>, vector<48x128xf32>, vector<16x128xf32> -> vector<16x128xf32>
    %183 = vector.extract_strided_slice %4 {offsets = [0, 15], sizes = [16, 1], strides = [1, 1]} : vector<32x33xf32> to vector<16x1xf32>
    %184 = vector.broadcast %183 : vector<16x1xf32> to vector<16x128xf32>
    %185 = arith.addf %182, %184 : vector<16x128xf32>
    %186 = vector.extract_strided_slice %4 {offsets = [5, 4], sizes = [1, 1], strides = [1, 1]} : vector<32x33xf32> to vector<1x1xf32>
    %cst_62 = arith.constant 0.000000e+00 : f32
    %187 = vector.broadcast %cst_62 : f32 to vector<16x128xf32>
    %188 = arith.cmpf oge, %185, %187 : vector<16x128xf32>
    %189 = vector.broadcast %186 : vector<1x1xf32> to vector<16x128xf32>
    %190 = arith.mulf %189, %185 : vector<16x128xf32>
    %191 = arith.select %188, %185, %190 : vector<16x128xi1>, vector<16x128xf32>
    %192 = vector.extract_strided_slice %4 {offsets = [0, 16], sizes = [16, 1], strides = [1, 1]} : vector<32x33xf32> to vector<16x1xf32>
    %193 = vector.extract_strided_slice %4 {offsets = [0, 17], sizes = [16, 1], strides = [1, 1]} : vector<32x33xf32> to vector<16x1xf32>
    %194 = vector.shape_cast %191 : vector<16x128xf32> to vector<1x16x128xf32>
    %cst_63 = arith.constant dense<0.000000e+00> : vector<1xf32>
    %195 = vector.multi_reduction <add>, %194, %cst_63 [1, 2] : vector<1x16x128xf32> to vector<1xf32>
    %196 = vector.shape_cast %195 : vector<1xf32> to vector<1x1x1xf32>
    %197 = vector.extract %196[0, 0, 0] : f32 from vector<1x1x1xf32>
    %cst_64 = arith.constant 4.8828125E-4 : f32
    %198 = arith.mulf %197, %cst_64 : f32
    %199 = arith.mulf %191, %191 : vector<16x128xf32>
    %200 = vector.shape_cast %199 : vector<16x128xf32> to vector<1x16x128xf32>
    %cst_65 = arith.constant dense<0.000000e+00> : vector<1xf32>
    %201 = vector.multi_reduction <add>, %200, %cst_65 [1, 2] : vector<1x16x128xf32> to vector<1xf32>
    %202 = vector.shape_cast %201 : vector<1xf32> to vector<1x1x1xf32>
    %203 = vector.extract %202[0, 0, 0] : f32 from vector<1x1x1xf32>
    %cst_66 = arith.constant 4.8828125E-4 : f32
    %204 = arith.mulf %203, %cst_66 : f32
    %205 = arith.mulf %198, %198 : f32
    %206 = arith.subf %204, %205 : f32
    %207 = vector.broadcast %198 : f32 to vector<16x128xf32>
    %208 = arith.subf %191, %207 : vector<16x128xf32>
    %cst_67 = arith.constant 9.99999974E-6 : f32
    %209 = arith.addf %206, %cst_67 : f32
    %210 = math.rsqrt %209 : f32
    %211 = vector.broadcast %210 : f32 to vector<16x128xf32>
    %212 = arith.mulf %208, %211 : vector<16x128xf32>
    %213 = vector.broadcast %192 : vector<16x1xf32> to vector<16x128xf32>
    %214 = arith.mulf %212, %213 : vector<16x128xf32>
    %215 = vector.broadcast %193 : vector<16x1xf32> to vector<16x128xf32>
    %216 = arith.addf %214, %215 : vector<16x128xf32>
    %c1_68 = arith.constant 1 : index
    %c0_69 = arith.constant 0 : index
    %c0_70 = arith.constant 0 : index
    %217 = vector.load %arg8[%c1_68, %c0_69, %c0_70] : memref<4x32x16xf32, #tpu.memory_space<vmem>>, vector<1x32x16xf32>
    %218 = vector.shape_cast %217 : vector<1x32x16xf32> to vector<32x16xf32>
    %cst_71 = arith.constant dense<0.000000e+00> : vector<32x128xf32>
    %219 = tpu.matmul %218, %216, %cst_71 {dimension_numbers = #tpu.dot_dimension_numbers<[1], [0], [0], [1], [0, 0, 1, 1], [], []>} : vector<32x16xf32>, vector<16x128xf32>, vector<32x128xf32> -> vector<32x128xf32>
    %220 = arith.addf %131, %219 : vector<32x128xf32>
    %221 = vector.extract_strided_slice %4 {offsets = [0, 18], sizes = [32, 1], strides = [1, 1]} : vector<32x33xf32> to vector<32x1xf32>
    %222 = vector.broadcast %221 : vector<32x1xf32> to vector<32x128xf32>
    %223 = arith.addf %220, %222 : vector<32x128xf32>
    %c2 = arith.constant 2 : index
    %c0_72 = arith.constant 0 : index
    %c0_73 = arith.constant 0 : index
    %224 = vector.load %arg5[%c2, %c0_72, %c0_73] : memref<4x16x32xf32, #tpu.memory_space<vmem>>, vector<1x16x32xf32>
    %225 = vector.shape_cast %224 : vector<1x16x32xf32> to vector<16x32xf32>
    %cst_74 = arith.constant dense<0.000000e+00> : vector<16x128xf32>
    %226 = tpu.matmul %225, %223, %cst_74 {dimension_numbers = #tpu.dot_dimension_numbers<[1], [0], [0], [1], [0, 0, 1, 1], [], []>} : vector<16x32xf32>, vector<32x128xf32>, vector<16x128xf32> -> vector<16x128xf32>
    %227 = vector.extract_strided_slice %4 {offsets = [0, 19], sizes = [16, 1], strides = [1, 1]} : vector<32x33xf32> to vector<16x1xf32>
    %228 = vector.broadcast %227 : vector<16x1xf32> to vector<16x128xf32>
    %229 = arith.addf %226, %228 : vector<16x128xf32>
    %230 = vector.extract_strided_slice %6 {offsets = [16, 0], sizes = [16, 1], strides = [1, 1]} : vector<32x1xf32> to vector<16x1xf32>
    %231 = vector.broadcast %230 : vector<16x1xf32> to vector<16x128xf32>
    %232 = arith.addf %229, %231 : vector<16x128xf32>
    %233 = vector.extract_strided_slice %4 {offsets = [2, 4], sizes = [1, 1], strides = [1, 1]} : vector<32x33xf32> to vector<1x1xf32>
    %cst_75 = arith.constant 0.000000e+00 : f32
    %234 = vector.broadcast %cst_75 : f32 to vector<16x128xf32>
    %235 = arith.cmpf oge, %232, %234 : vector<16x128xf32>
    %236 = vector.broadcast %233 : vector<1x1xf32> to vector<16x128xf32>
    %237 = arith.mulf %236, %232 : vector<16x128xf32>
    %238 = arith.select %235, %232, %237 : vector<16x128xi1>, vector<16x128xf32>
    %239 = vector.extract_strided_slice %4 {offsets = [0, 20], sizes = [16, 1], strides = [1, 1]} : vector<32x33xf32> to vector<16x1xf32>
    %240 = vector.extract_strided_slice %4 {offsets = [0, 21], sizes = [16, 1], strides = [1, 1]} : vector<32x33xf32> to vector<16x1xf32>
    %241 = vector.shape_cast %238 : vector<16x128xf32> to vector<1x16x128xf32>
    %cst_76 = arith.constant dense<0.000000e+00> : vector<1xf32>
    %242 = vector.multi_reduction <add>, %241, %cst_76 [1, 2] : vector<1x16x128xf32> to vector<1xf32>
    %243 = vector.shape_cast %242 : vector<1xf32> to vector<1x1x1xf32>
    %244 = vector.extract %243[0, 0, 0] : f32 from vector<1x1x1xf32>
    %cst_77 = arith.constant 4.8828125E-4 : f32
    %245 = arith.mulf %244, %cst_77 : f32
    %246 = arith.mulf %238, %238 : vector<16x128xf32>
    %247 = vector.shape_cast %246 : vector<16x128xf32> to vector<1x16x128xf32>
    %cst_78 = arith.constant dense<0.000000e+00> : vector<1xf32>
    %248 = vector.multi_reduction <add>, %247, %cst_78 [1, 2] : vector<1x16x128xf32> to vector<1xf32>
    %249 = vector.shape_cast %248 : vector<1xf32> to vector<1x1x1xf32>
    %250 = vector.extract %249[0, 0, 0] : f32 from vector<1x1x1xf32>
    %cst_79 = arith.constant 4.8828125E-4 : f32
    %251 = arith.mulf %250, %cst_79 : f32
    %252 = arith.mulf %245, %245 : f32
    %253 = arith.subf %251, %252 : f32
    %254 = vector.broadcast %245 : f32 to vector<16x128xf32>
    %255 = arith.subf %238, %254 : vector<16x128xf32>
    %cst_80 = arith.constant 9.99999974E-6 : f32
    %256 = arith.addf %253, %cst_80 : f32
    %257 = math.rsqrt %256 : f32
    %258 = vector.broadcast %257 : f32 to vector<16x128xf32>
    %259 = arith.mulf %255, %258 : vector<16x128xf32>
    %260 = vector.broadcast %239 : vector<16x1xf32> to vector<16x128xf32>
    %261 = arith.mulf %259, %260 : vector<16x128xf32>
    %262 = vector.broadcast %240 : vector<16x1xf32> to vector<16x128xf32>
    %263 = arith.addf %261, %262 : vector<16x128xf32>
    %c1_i32_81 = arith.constant 1 : i32
    %264 = vector.broadcast %c1_i32_81 : i32 to vector<16x128xi32>
    %265 = arith.cmpi sge, %36, %264 : vector<16x128xi32>
    %c1_i32_82 = arith.constant 1 : i32
    %266 = tpu.dynamic_rotate %263 by %c1_i32_82 dim 1 : vector<16x128xf32>, i32 -> vector<16x128xf32>
    %cst_83 = arith.constant 0.000000e+00 : f32
    %267 = vector.broadcast %cst_83 : f32 to vector<16x128xf32>
    %268 = arith.select %265, %266, %267 : vector<16x128xi1>, vector<16x128xf32>
    %c127_i32_84 = arith.constant 127 : i32
    %269 = vector.broadcast %c127_i32_84 : i32 to vector<16x128xi32>
    %270 = arith.cmpi slt, %36, %269 : vector<16x128xi32>
    %c127_i32_85 = arith.constant 127 : i32
    %271 = tpu.dynamic_rotate %263 by %c127_i32_85 dim 1 : vector<16x128xf32>, i32 -> vector<16x128xf32>
    %cst_86 = arith.constant 0.000000e+00 : f32
    %272 = vector.broadcast %cst_86 : f32 to vector<16x128xf32>
    %273 = arith.select %270, %271, %272 : vector<16x128xi1>, vector<16x128xf32>
    %274 = tpu.concatenate %268, %263, %273 in 0 : vector<16x128xf32>, vector<16x128xf32>, vector<16x128xf32> -> vector<48x128xf32>
    %c2_87 = arith.constant 2 : index
    %c0_88 = arith.constant 0 : index
    %c0_89 = arith.constant 0 : index
    %275 = vector.load %arg7[%c2_87, %c0_88, %c0_89] : memref<4x16x48xf32, #tpu.memory_space<vmem>>, vector<1x16x48xf32>
    %276 = vector.shape_cast %275 : vector<1x16x48xf32> to vector<16x48xf32>
    %cst_90 = arith.constant dense<0.000000e+00> : vector<16x128xf32>
    %277 = tpu.matmul %276, %274, %cst_90 {dimension_numbers = #tpu.dot_dimension_numbers<[1], [0], [0], [1], [0, 0, 1, 1], [], []>} : vector<16x48xf32>, vector<48x128xf32>, vector<16x128xf32> -> vector<16x128xf32>
    %278 = vector.extract_strided_slice %4 {offsets = [0, 22], sizes = [16, 1], strides = [1, 1]} : vector<32x33xf32> to vector<16x1xf32>
    %279 = vector.broadcast %278 : vector<16x1xf32> to vector<16x128xf32>
    %280 = arith.addf %277, %279 : vector<16x128xf32>
    %281 = vector.extract_strided_slice %4 {offsets = [6, 4], sizes = [1, 1], strides = [1, 1]} : vector<32x33xf32> to vector<1x1xf32>
    %cst_91 = arith.constant 0.000000e+00 : f32
    %282 = vector.broadcast %cst_91 : f32 to vector<16x128xf32>
    %283 = arith.cmpf oge, %280, %282 : vector<16x128xf32>
    %284 = vector.broadcast %281 : vector<1x1xf32> to vector<16x128xf32>
    %285 = arith.mulf %284, %280 : vector<16x128xf32>
    %286 = arith.select %283, %280, %285 : vector<16x128xi1>, vector<16x128xf32>
    %287 = vector.extract_strided_slice %4 {offsets = [0, 23], sizes = [16, 1], strides = [1, 1]} : vector<32x33xf32> to vector<16x1xf32>
    %288 = vector.extract_strided_slice %4 {offsets = [0, 24], sizes = [16, 1], strides = [1, 1]} : vector<32x33xf32> to vector<16x1xf32>
    %289 = vector.shape_cast %286 : vector<16x128xf32> to vector<1x16x128xf32>
    %cst_92 = arith.constant dense<0.000000e+00> : vector<1xf32>
    %290 = vector.multi_reduction <add>, %289, %cst_92 [1, 2] : vector<1x16x128xf32> to vector<1xf32>
    %291 = vector.shape_cast %290 : vector<1xf32> to vector<1x1x1xf32>
    %292 = vector.extract %291[0, 0, 0] : f32 from vector<1x1x1xf32>
    %cst_93 = arith.constant 4.8828125E-4 : f32
    %293 = arith.mulf %292, %cst_93 : f32
    %294 = arith.mulf %286, %286 : vector<16x128xf32>
    %295 = vector.shape_cast %294 : vector<16x128xf32> to vector<1x16x128xf32>
    %cst_94 = arith.constant dense<0.000000e+00> : vector<1xf32>
    %296 = vector.multi_reduction <add>, %295, %cst_94 [1, 2] : vector<1x16x128xf32> to vector<1xf32>
    %297 = vector.shape_cast %296 : vector<1xf32> to vector<1x1x1xf32>
    %298 = vector.extract %297[0, 0, 0] : f32 from vector<1x1x1xf32>
    %cst_95 = arith.constant 4.8828125E-4 : f32
    %299 = arith.mulf %298, %cst_95 : f32
    %300 = arith.mulf %293, %293 : f32
    %301 = arith.subf %299, %300 : f32
    %302 = vector.broadcast %293 : f32 to vector<16x128xf32>
    %303 = arith.subf %286, %302 : vector<16x128xf32>
    %cst_96 = arith.constant 9.99999974E-6 : f32
    %304 = arith.addf %301, %cst_96 : f32
    %305 = math.rsqrt %304 : f32
    %306 = vector.broadcast %305 : f32 to vector<16x128xf32>
    %307 = arith.mulf %303, %306 : vector<16x128xf32>
    %308 = vector.broadcast %287 : vector<16x1xf32> to vector<16x128xf32>
    %309 = arith.mulf %307, %308 : vector<16x128xf32>
    %310 = vector.broadcast %288 : vector<16x1xf32> to vector<16x128xf32>
    %311 = arith.addf %309, %310 : vector<16x128xf32>
    %c2_97 = arith.constant 2 : index
    %c0_98 = arith.constant 0 : index
    %c0_99 = arith.constant 0 : index
    %312 = vector.load %arg8[%c2_97, %c0_98, %c0_99] : memref<4x32x16xf32, #tpu.memory_space<vmem>>, vector<1x32x16xf32>
    %313 = vector.shape_cast %312 : vector<1x32x16xf32> to vector<32x16xf32>
    %cst_100 = arith.constant dense<0.000000e+00> : vector<32x128xf32>
    %314 = tpu.matmul %313, %311, %cst_100 {dimension_numbers = #tpu.dot_dimension_numbers<[1], [0], [0], [1], [0, 0, 1, 1], [], []>} : vector<32x16xf32>, vector<16x128xf32>, vector<32x128xf32> -> vector<32x128xf32>
    %315 = arith.addf %223, %314 : vector<32x128xf32>
    %316 = vector.extract_strided_slice %4 {offsets = [0, 25], sizes = [32, 1], strides = [1, 1]} : vector<32x33xf32> to vector<32x1xf32>
    %317 = vector.broadcast %316 : vector<32x1xf32> to vector<32x128xf32>
    %318 = arith.addf %315, %317 : vector<32x128xf32>
    %c3 = arith.constant 3 : index
    %c0_101 = arith.constant 0 : index
    %c0_102 = arith.constant 0 : index
    %319 = vector.load %arg5[%c3, %c0_101, %c0_102] : memref<4x16x32xf32, #tpu.memory_space<vmem>>, vector<1x16x32xf32>
    %320 = vector.shape_cast %319 : vector<1x16x32xf32> to vector<16x32xf32>
    %cst_103 = arith.constant dense<0.000000e+00> : vector<16x128xf32>
    %321 = tpu.matmul %320, %318, %cst_103 {dimension_numbers = #tpu.dot_dimension_numbers<[1], [0], [0], [1], [0, 0, 1, 1], [], []>} : vector<16x32xf32>, vector<32x128xf32>, vector<16x128xf32> -> vector<16x128xf32>
    %322 = vector.extract_strided_slice %4 {offsets = [0, 26], sizes = [16, 1], strides = [1, 1]} : vector<32x33xf32> to vector<16x1xf32>
    %323 = vector.broadcast %322 : vector<16x1xf32> to vector<16x128xf32>
    %324 = arith.addf %321, %323 : vector<16x128xf32>
    %325 = vector.extract_strided_slice %4 {offsets = [3, 4], sizes = [1, 1], strides = [1, 1]} : vector<32x33xf32> to vector<1x1xf32>
    %cst_104 = arith.constant 0.000000e+00 : f32
    %326 = vector.broadcast %cst_104 : f32 to vector<16x128xf32>
    %327 = arith.cmpf oge, %324, %326 : vector<16x128xf32>
    %328 = vector.broadcast %325 : vector<1x1xf32> to vector<16x128xf32>
    %329 = arith.mulf %328, %324 : vector<16x128xf32>
    %330 = arith.select %327, %324, %329 : vector<16x128xi1>, vector<16x128xf32>
    %331 = vector.extract_strided_slice %4 {offsets = [0, 27], sizes = [16, 1], strides = [1, 1]} : vector<32x33xf32> to vector<16x1xf32>
    %332 = vector.extract_strided_slice %4 {offsets = [0, 28], sizes = [16, 1], strides = [1, 1]} : vector<32x33xf32> to vector<16x1xf32>
    %333 = vector.shape_cast %330 : vector<16x128xf32> to vector<1x16x128xf32>
    %cst_105 = arith.constant dense<0.000000e+00> : vector<1xf32>
    %334 = vector.multi_reduction <add>, %333, %cst_105 [1, 2] : vector<1x16x128xf32> to vector<1xf32>
    %335 = vector.shape_cast %334 : vector<1xf32> to vector<1x1x1xf32>
    %336 = vector.extract %335[0, 0, 0] : f32 from vector<1x1x1xf32>
    %cst_106 = arith.constant 4.8828125E-4 : f32
    %337 = arith.mulf %336, %cst_106 : f32
    %338 = arith.mulf %330, %330 : vector<16x128xf32>
    %339 = vector.shape_cast %338 : vector<16x128xf32> to vector<1x16x128xf32>
    %cst_107 = arith.constant dense<0.000000e+00> : vector<1xf32>
    %340 = vector.multi_reduction <add>, %339, %cst_107 [1, 2] : vector<1x16x128xf32> to vector<1xf32>
    %341 = vector.shape_cast %340 : vector<1xf32> to vector<1x1x1xf32>
    %342 = vector.extract %341[0, 0, 0] : f32 from vector<1x1x1xf32>
    %cst_108 = arith.constant 4.8828125E-4 : f32
    %343 = arith.mulf %342, %cst_108 : f32
    %344 = arith.mulf %337, %337 : f32
    %345 = arith.subf %343, %344 : f32
    %346 = vector.broadcast %337 : f32 to vector<16x128xf32>
    %347 = arith.subf %330, %346 : vector<16x128xf32>
    %cst_109 = arith.constant 9.99999974E-6 : f32
    %348 = arith.addf %345, %cst_109 : f32
    %349 = math.rsqrt %348 : f32
    %350 = vector.broadcast %349 : f32 to vector<16x128xf32>
    %351 = arith.mulf %347, %350 : vector<16x128xf32>
    %352 = vector.broadcast %331 : vector<16x1xf32> to vector<16x128xf32>
    %353 = arith.mulf %351, %352 : vector<16x128xf32>
    %354 = vector.broadcast %332 : vector<16x1xf32> to vector<16x128xf32>
    %355 = arith.addf %353, %354 : vector<16x128xf32>
    %c2_i32_110 = arith.constant 2 : i32
    %356 = vector.broadcast %c2_i32_110 : i32 to vector<16x128xi32>
    %357 = arith.cmpi sge, %36, %356 : vector<16x128xi32>
    %c2_i32_111 = arith.constant 2 : i32
    %358 = tpu.dynamic_rotate %355 by %c2_i32_111 dim 1 : vector<16x128xf32>, i32 -> vector<16x128xf32>
    %cst_112 = arith.constant 0.000000e+00 : f32
    %359 = vector.broadcast %cst_112 : f32 to vector<16x128xf32>
    %360 = arith.select %357, %358, %359 : vector<16x128xi1>, vector<16x128xf32>
    %c126_i32_113 = arith.constant 126 : i32
    %361 = vector.broadcast %c126_i32_113 : i32 to vector<16x128xi32>
    %362 = arith.cmpi slt, %36, %361 : vector<16x128xi32>
    %c126_i32_114 = arith.constant 126 : i32
    %363 = tpu.dynamic_rotate %355 by %c126_i32_114 dim 1 : vector<16x128xf32>, i32 -> vector<16x128xf32>
    %cst_115 = arith.constant 0.000000e+00 : f32
    %364 = vector.broadcast %cst_115 : f32 to vector<16x128xf32>
    %365 = arith.select %362, %363, %364 : vector<16x128xi1>, vector<16x128xf32>
    %366 = tpu.concatenate %360, %355, %365 in 0 : vector<16x128xf32>, vector<16x128xf32>, vector<16x128xf32> -> vector<48x128xf32>
    %c3_116 = arith.constant 3 : index
    %c0_117 = arith.constant 0 : index
    %c0_118 = arith.constant 0 : index
    %367 = vector.load %arg7[%c3_116, %c0_117, %c0_118] : memref<4x16x48xf32, #tpu.memory_space<vmem>>, vector<1x16x48xf32>
    %368 = vector.shape_cast %367 : vector<1x16x48xf32> to vector<16x48xf32>
    %cst_119 = arith.constant dense<0.000000e+00> : vector<16x128xf32>
    %369 = tpu.matmul %368, %366, %cst_119 {dimension_numbers = #tpu.dot_dimension_numbers<[1], [0], [0], [1], [0, 0, 1, 1], [], []>} : vector<16x48xf32>, vector<48x128xf32>, vector<16x128xf32> -> vector<16x128xf32>
    %370 = vector.extract_strided_slice %4 {offsets = [0, 29], sizes = [16, 1], strides = [1, 1]} : vector<32x33xf32> to vector<16x1xf32>
    %371 = vector.broadcast %370 : vector<16x1xf32> to vector<16x128xf32>
    %372 = arith.addf %369, %371 : vector<16x128xf32>
    %373 = vector.extract_strided_slice %4 {offsets = [7, 4], sizes = [1, 1], strides = [1, 1]} : vector<32x33xf32> to vector<1x1xf32>
    %cst_120 = arith.constant 0.000000e+00 : f32
    %374 = vector.broadcast %cst_120 : f32 to vector<16x128xf32>
    %375 = arith.cmpf oge, %372, %374 : vector<16x128xf32>
    %376 = vector.broadcast %373 : vector<1x1xf32> to vector<16x128xf32>
    %377 = arith.mulf %376, %372 : vector<16x128xf32>
    %378 = arith.select %375, %372, %377 : vector<16x128xi1>, vector<16x128xf32>
    %379 = vector.extract_strided_slice %4 {offsets = [0, 30], sizes = [16, 1], strides = [1, 1]} : vector<32x33xf32> to vector<16x1xf32>
    %380 = vector.extract_strided_slice %4 {offsets = [0, 31], sizes = [16, 1], strides = [1, 1]} : vector<32x33xf32> to vector<16x1xf32>
    %381 = vector.shape_cast %378 : vector<16x128xf32> to vector<1x16x128xf32>
    %cst_121 = arith.constant dense<0.000000e+00> : vector<1xf32>
    %382 = vector.multi_reduction <add>, %381, %cst_121 [1, 2] : vector<1x16x128xf32> to vector<1xf32>
    %383 = vector.shape_cast %382 : vector<1xf32> to vector<1x1x1xf32>
    %384 = vector.extract %383[0, 0, 0] : f32 from vector<1x1x1xf32>
    %cst_122 = arith.constant 4.8828125E-4 : f32
    %385 = arith.mulf %384, %cst_122 : f32
    %386 = arith.mulf %378, %378 : vector<16x128xf32>
    %387 = vector.shape_cast %386 : vector<16x128xf32> to vector<1x16x128xf32>
    %cst_123 = arith.constant dense<0.000000e+00> : vector<1xf32>
    %388 = vector.multi_reduction <add>, %387, %cst_123 [1, 2] : vector<1x16x128xf32> to vector<1xf32>
    %389 = vector.shape_cast %388 : vector<1xf32> to vector<1x1x1xf32>
    %390 = vector.extract %389[0, 0, 0] : f32 from vector<1x1x1xf32>
    %cst_124 = arith.constant 4.8828125E-4 : f32
    %391 = arith.mulf %390, %cst_124 : f32
    %392 = arith.mulf %385, %385 : f32
    %393 = arith.subf %391, %392 : f32
    %394 = vector.broadcast %385 : f32 to vector<16x128xf32>
    %395 = arith.subf %378, %394 : vector<16x128xf32>
    %cst_125 = arith.constant 9.99999974E-6 : f32
    %396 = arith.addf %393, %cst_125 : f32
    %397 = math.rsqrt %396 : f32
    %398 = vector.broadcast %397 : f32 to vector<16x128xf32>
    %399 = arith.mulf %395, %398 : vector<16x128xf32>
    %400 = vector.broadcast %379 : vector<16x1xf32> to vector<16x128xf32>
    %401 = arith.mulf %399, %400 : vector<16x128xf32>
    %402 = vector.broadcast %380 : vector<16x1xf32> to vector<16x128xf32>
    %403 = arith.addf %401, %402 : vector<16x128xf32>
    %c3_126 = arith.constant 3 : index
    %c0_127 = arith.constant 0 : index
    %c0_128 = arith.constant 0 : index
    %404 = vector.load %arg8[%c3_126, %c0_127, %c0_128] : memref<4x32x16xf32, #tpu.memory_space<vmem>>, vector<1x32x16xf32>
    %405 = vector.shape_cast %404 : vector<1x32x16xf32> to vector<32x16xf32>
    %cst_129 = arith.constant dense<0.000000e+00> : vector<32x128xf32>
    %406 = tpu.matmul %405, %403, %cst_129 {dimension_numbers = #tpu.dot_dimension_numbers<[1], [0], [0], [1], [0, 0, 1, 1], [], []>} : vector<32x16xf32>, vector<16x128xf32>, vector<32x128xf32> -> vector<32x128xf32>
    %407 = arith.addf %318, %406 : vector<32x128xf32>
    %408 = vector.extract_strided_slice %4 {offsets = [0, 32], sizes = [32, 1], strides = [1, 1]} : vector<32x33xf32> to vector<32x1xf32>
    %409 = vector.broadcast %408 : vector<32x1xf32> to vector<32x128xf32>
    %410 = arith.addf %407, %409 : vector<32x128xf32>
    %c0_130 = arith.constant 0 : index
    %c0_131 = arith.constant 0 : index
    %411 = vector.load %arg9[%c0_130, %c0_131] : memref<24x32xf32, #tpu.memory_space<vmem>>, vector<24x32xf32>
    %cst_132 = arith.constant dense<0.000000e+00> : vector<24x128xf32>
    %412 = tpu.matmul %411, %410, %cst_132 {dimension_numbers = #tpu.dot_dimension_numbers<[1], [0], [0], [1], [0, 0, 1, 1], [], []>} : vector<24x32xf32>, vector<32x128xf32>, vector<24x128xf32> -> vector<24x128xf32>
    %413 = vector.extract_strided_slice %4 {offsets = [0, 3], sizes = [24, 1], strides = [1, 1]} : vector<32x33xf32> to vector<24x1xf32>
    %414 = vector.broadcast %413 : vector<24x1xf32> to vector<24x128xf32>
    %415 = arith.addf %412, %414 : vector<24x128xf32>
    %cst_133 = arith.constant 0.000000e+00 : f32
    %416 = vector.broadcast %cst_133 : f32 to vector<24x128xf32>
    %417 = arith.maximumf %415, %416 : vector<24x128xf32>
    %c0_134 = arith.constant 0 : index
    %c0_135 = arith.constant 0 : index
    %c0_136 = arith.constant 0 : index
    %418 = vector.load %arg2[%c0_134, %c0_135, %c0_136] : memref<1x24x128xf32, #tpu.memory_space<vmem>>, vector<1x24x128xf32>
    %419 = vector.shape_cast %418 : vector<1x24x128xf32> to vector<24x128xf32>
    %420 = arith.mulf %417, %419 : vector<24x128xf32>
    %c0_137 = arith.constant 0 : index
    %c0_138 = arith.constant 0 : index
    %c0_139 = arith.constant 0 : index
    %421 = vector.load %arg11[%c0_137, %c0_138, %c0_139] : memref<1x24x128xf32, #tpu.memory_space<vmem>>, vector<1x24x128xf32>
    %422 = vector.shape_cast %421 : vector<1x24x128xf32> to vector<24x128xf32>
    %423 = vector.shape_cast %420 : vector<24x128xf32> to vector<1x24x128xf32>
    tpu.vector_store %arg11[%c0_137, %c0_138, %c0_139], %423 {strides = array<i32>} : memref<1x24x128xf32, #tpu.memory_space<vmem>>, vector<1x24x128xf32>,
    return
  }
  func.func @transform_0(%arg0: i32) -> (i32, i32, i32) {
    %c0_i32 = arith.constant 0 : i32
    %c0_i32_0 = arith.constant 0 : i32
    %c0_i32_1 = arith.constant 0 : i32
    return %arg0, %c0_i32, %c0_i32_0 : i32, i32, i32
  }
  func.func @transform_1(%arg0: i32) -> (i32, i32, i32) {
    %c0_i32 = arith.constant 0 : i32
    %c0_i32_0 = arith.constant 0 : i32
    %c0_i32_1 = arith.constant 0 : i32
    return %arg0, %c0_i32, %c0_i32_0 : i32, i32, i32
  }
  func.func @transform_2(%arg0: i32) -> (i32, i32, i32) {
    %c0_i32 = arith.constant 0 : i32
    %c0_i32_0 = arith.constant 0 : i32
    %c0_i32_1 = arith.constant 0 : i32
    return %arg0, %c0_i32, %c0_i32_0 : i32, i32, i32
  }
  func.func @transform_3(%arg0: i32) -> (i32, i32) {
    %c0_i32 = arith.constant 0 : i32
    %c0_i32_0 = arith.constant 0 : i32
    %c0_i32_1 = arith.constant 0 : i32
    return %c0_i32, %c0_i32_0 : i32, i32
  }
  func.func @transform_4(%arg0: i32) -> (i32, i32, i32) {
    %c0_i32 = arith.constant 0 : i32
    %c0_i32_0 = arith.constant 0 : i32
    %c0_i32_1 = arith.constant 0 : i32
    %c0_i32_2 = arith.constant 0 : i32
    return %c0_i32, %c0_i32_0, %c0_i32_1 : i32, i32, i32
  }
  func.func @transform_5(%arg0: i32) -> (i32, i32) {
    %c0_i32 = arith.constant 0 : i32
    %c0_i32_0 = arith.constant 0 : i32
    %c0_i32_1 = arith.constant 0 : i32
    return %c0_i32, %c0_i32_0 : i32, i32
  }
  func.func @transform_6(%arg0: i32) -> (i32, i32, i32) {
    %c0_i32 = arith.constant 0 : i32
    %c0_i32_0 = arith.constant 0 : i32
    %c0_i32_1 = arith.constant 0 : i32
    %c0_i32_2 = arith.constant 0 : i32
    return %c0_i32, %c0_i32_0, %c0_i32_1 : i32, i32, i32
  }
  func.func @transform_7(%arg0: i32) -> (i32, i32, i32) {
    %c0_i32 = arith.constant 0 : i32
    %c0_i32_0 = arith.constant 0 : i32
    %c0_i32_1 = arith.constant 0 : i32
    %c0_i32_2 = arith.constant 0 : i32
    return %c0_i32, %c0_i32_0, %c0_i32_1 : i32, i32, i32
  }
  func.func @transform_8(%arg0: i32) -> (i32, i32) {
    %c0_i32 = arith.constant 0 : i32
    %c0_i32_0 = arith.constant 0 : i32
    %c0_i32_1 = arith.constant 0 : i32
    return %c0_i32, %c0_i32_0 : i32, i32
  }
  func.func @transform_9(%arg0: i32) -> (i32, i32) {
    %c0_i32 = arith.constant 0 : i32
    %c0_i32_0 = arith.constant 0 : i32
    %c0_i32_1 = arith.constant 0 : i32
    return %c0_i32, %c0_i32_0 : i32, i32
  }
  func.func @transform_10(%arg0: i32) -> (i32, i32, i32) {
    %c0_i32 = arith.constant 0 : i32
    %c0_i32_0 = arith.constant 0 : i32
    %c0_i32_1 = arith.constant 0 : i32
    return %arg0, %c0_i32, %c0_i32_0 : i32, i32, i32
  }
}

</mosaic_0001>

<bundles_post_ra>
// kernel: tpu_custom_call.1
= control target key start
LH: loop header
LB: loop body
LE: loop exit
PB: predicated region body
PF: predicated region fallthrough
CT: control target
= control target key end

     0   :  { %s4267_s0 = inlined_call_operand.vmem [shape: f32[2,24,128], index: 0, kind: input, shape index: {}]   ;;  %s4268_s1 = inlined_call_operand.vmem [shape: f32[2,24,128], index: 1, kind: input, shape index: {}]   ;;  %s4269_s2 = inlined_call_operand.vmem [shape: f32[2,16,1], index: 2, kind: input, shape index: {}]   ;;  %s4270_s3 = inlined_call_operand.vmem [shape: f32[32,24], index: 3, kind: input, shape index: {}]   ;;  %s4271_s4 = inlined_call_operand.vmem [shape: f32[4,16,32], index: 4, kind: input, shape index: {}]   ;;  %s4272_s5 = inlined_call_operand.vmem [shape: f32[32,16], index: 5, kind: input, shape index: {}]   ;;  %s4273_s6 = inlined_call_operand.vmem [shape: f32[4,16,48], index: 6, kind: input, shape index: {}]   ;;  %s4274_s7 = inlined_call_operand.vmem [shape: f32[4,32,16], index: 7, kind: input, shape index: {}]   ;;  %s4275_s8 = inlined_call_operand.vmem [shape: f32[24,32], index: 8, kind: input, shape index: {}]   ;;  %s4276_s9 = inlined_call_operand.vmem [shape: f32[32,33], index: 9, kind: input, shape index: {}]   ;;  %s4277_s10 = inlined_call_operand.hbm [shape: f32[2,24,128], index: 10, kind: output, shape index: {}]  }
   0x1   :  { %4285 = sst [smem:[#allocation5_spill]] %s4267_s0 }
   0x2   :  { %15 = vsyncpa [#allocation3], 0 }
   0x3   :  { %17 = vsyncpa [#allocation3 + $0x1], 0  ;;  %s3698_s13 = smov 0   ;;  %s3700_s14 = smov 0  }
   0x4   :  { %s3702_s15 = smov 0   ;;  %s3704_s16 = smov 0  }
   0x5 LB: > { %s3719_s17 = sadd.s32 4294967295, %s3598_s16   ;;  %s2769_s18 = sadd.s32 4294967294, %s3598_s16   ;;  %s3598_s16 = sphi %s3704_s16, %s4306_s16   ;;  %s3594_s15 = sphi %s3702_s15, %s4305_s15   ;;  %s3590_s14 = sphi %s3700_s14, %s4304_s14   ;;  %s3586_s13 = sphi %s3698_s13, %s4303_s13  }
   0x6   : > { %s3723_s19 = sadd.s32 1, %s3598_s16   ;;  %s255_s20 = sadd.s32 1, %s3594_s15 }
   0x7   : > { %s252_s21 = ssub.s32 %s3598_s16, %s3723_s19  ;;  %p265_p0 = scmp.ne.s32.totalorder %s3594_s15, %s3590_s14 }
   0x8   : > { %p253_p1 = scmp.eq.s32.totalorder %s252_s21, 0  ;;  %p266_p2 = scmp.eq.s32.totalorder %s3719_s17, 1 }
   0x9   : > { %p271_p3 = scmp.ne.s32.totalorder %s3590_s14, %s3586_s13  ;;  %p272_p4 = scmp.eq.s32.totalorder %s2769_s18, 1 }
   0xa   : > { %s3734_s22 = scalar_select %p253_p1, %s3594_s15, %s255_s20  }
   0xb   : > { %p3736_p5 = por %p266_p2, %p265_p0  ;;  %p3740_p6 = por %p272_p4, %p271_p3 }
   0xc   : > { %p2772_p7 = scmp.ge.s32.totalorder %s3598_s16, 1  ;;  %p335_p8 = scmp.lt.s32.totalorder %s3598_s16, 3 }
   0xe   : > { %p336_p9 = pnand %p2772_p7, %p335_p8 }
   0xf   : > { %v3749_v0 = vld [vmem:[%s4276_s9] sm:$0xff] (!%p336_p9)  ;;  %p383_p10 = scmp.lt.s32.totalorder (!%p336_p9), %s3719_s17, 1  ;;  %v3600_v1 = vmov (!%p336_p9), 1   ;;  %v3601_v2 = vmov (!%p336_p9), 0   ;;  %v3761_v3 = vld [vmem:[%s4276_s9 + $0x8] sm:$0xff] (!%p336_p9)  ;;  %v3772_v6 = vld [vmem:[%s4276_s9 + $0x10] sm:$0xff] (!%p336_p9) }
  0x10   : > { %339 = sbr.rel (%p336_p9) target bundleno = 6110 (0x17de), region = 60  ;;  %3422 = vset.pattern.permute.xlu1 (!%p336_p9), %v3600_v1  ;;  %3421 = vset.pattern.permute.xlu0 (!%p336_p9), %v3601_v2  ;;  %vm411_vm0 = vcmask (!%p336_p9), 130048   ;;  %v407_v8 = vld [vmem:[%s4272_s5] sm:$0xff] (!%p336_p9)  ;;  %v408_v9 = vld [vmem:[%s4272_s5 + $0x8] sm:$0xff] (!%p336_p9)  ;;  %v409_v10 = vld [vmem:[%s4272_s5 + $0x10] sm:$0xff] (!%p336_p9)  ;;  %vm595_vm1 = vcmask (!%p336_p9), 195584  }
  0x11   : > { %560 = vperm.xlu1 (!%p336_p9), %3422, %v3749_v0   ;;  %543 = vperm.xlu0 (!%p336_p9), %3421, %v3749_v0   ;;  %v410_v11 = vld [vmem:[%s4272_s5 + $0x18] sm:$0xff] (!%p336_p9)  ;;  %v574_v12 = vld [vmem:[%s4270_s3] sm:$0xff] (!%p336_p9)  ;;  %v3602_v13 = vmov (!%p336_p9), 2   ;;  %s4283_s28 = smov (!%p336_p9), 124   ;;  %v3604_v15 = vmov (!%p336_p9), 5   ;;  %s4288_s0 = sld [smem:[#allocation5_spill]] (!%p336_p9) }
  0x12   : > { %2968 = vmatprep.mubr.msk.f32.mxu1 (!%p336_p9), %vm411_vm0, %v407_v8  ;;  %v3801_v14 = vld [vmem:[%s4276_s9 + $0x18] sm:$0xff] (!%p336_p9)  ;;  %v575_v63 = vld [vmem:[%s4270_s3 + $0x8] sm:$0xff] (!%p336_p9)  ;;  %v576_v1 = vld [vmem:[%s4270_s3 + $0x10] sm:$0xff] (!%p336_p9)  ;;  %vm705_vm2 = vcmask (!%p336_p9), 261120   ;;  %vm890_vm5 = vcmask (!%p336_p9), 392192  }
  0x15   : > { %564 = vperm.xlu1 (!%p336_p9), %3422, %v3761_v3   ;;  %548 = vperm.xlu0 (!%p336_p9), %3421, %v3761_v3  }
  0x17   : > { %s3756_s27 = scalar_select %p383_p10, %s3719_s17, 1 }
  0x19   : > { %s2863_s30 = sshll.u32 %s3756_s27, 4  ;;  %568 = vperm.xlu1 %3422, %v3772_v6   ;;  %553 = vperm.xlu0 %3421, %v3772_v6   ;;  %s4278_s29 = smul.u32 24, %s3756_s27 }
  0x1a   : > { %s397_s18 = scalar_lea.vmem %s4269_s2, %s2863_s30 }
  0x1b   : > { %v401_v4 = vld [vmem:[%s397_s18] sm:$0xff]  ;;  %v402_v5 = vld [vmem:[%s397_s18 + $0x8] sm:$0xff]  ;;  %s387_s12 = scalar_lea.vmem %s4288_s0, %s4278_s29 }
  0x1c   : > { %v3147_v7 = vpack.c.bf16 %v402_v5, %v401_v4  ;;  %v398_v16 = vld [vmem:[%s387_s12] sm:$0xff]  ;;  %v399_v17 = vld [vmem:[%s387_s12 + $0x8] sm:$0xff]  ;;  %v400_v21 = vld [vmem:[%s387_s12 + $0x10] sm:$0xff] }
  0x1d   : > { %3424 = vset.pattern.permute.xlu1 %v3602_v13  ;;  %3423 = vset.pattern.permute.xlu0 %v3602_v13  ;;  %v509_v18 = vadd.f32 %v399_v17, %v398_v16  ;;  %v519_v19 = vmul.f32 %v398_v16, %v398_v16  ;;  %v520_v20 = vmul.f32 %v399_v17, %v399_v17  ;;  %v577_v4 = vld [vmem:[%s4270_s3 + $0x18] sm:$0xff] }
  0x1e   : > { %3148 = vmatprep.subr.bf16.mxu1 %v3147_v7  ;;  %583 = vperm.xlu1 %3424, %v3761_v3   ;;  %v521_v23 = vmul.f32 %v400_v21, %v400_v21 }
  0x1f   : > { %3150 = vmatpush3.bf16.msra.mxu1 %v3147_v7  ;;  %579 = vperm.xlu0 %3423, %v3749_v0   ;;  %v510_v22 = vadd.f32 %v509_v18, %v400_v21  ;;  %v522_v24 = vadd.f32 %v520_v20, %v519_v19 }
  0x21   : > { %v511_v25 = vrot.slane %v510_v22, 4  ;;  %v523_v26 = vadd.f32 %v522_v24, %v521_v23 }
  0x22   : > { %2969 = vmatmul.mubr.msk.f32.vlgmr.msra.gmra.mrb[0].mxu1 %vm411_vm0, %v408_v9  ;;  %587 = vperm.xlu1 %3424, %v3772_v6  }
  0x23   : > { %2971 = vmatprep.mubr.msk.f32.mxu1 %vm411_vm0, %v409_v10  ;;  %592 = vperm.xlu0 %3423, %v3801_v14   ;;  %v512_v27 = vadd.f32 %v511_v25, %v510_v22  ;;  %v524_v28 = vrot.slane %v523_v26, 4 }
  0x25   : > { %v513_v29 = vrot.slane %v512_v27, 2  ;;  %v525_v30 = vadd.f32 %v524_v28, %v523_v26  ;;  %v3605_v28 = vmov 6  }
  0x26   : > { %2972 = vmatmul.mubr.msk.f32.gmra.mrb[2].mxu1 %vm411_vm0, %v410_v11  ;;  %801 = vrot.lane.b32.xlu1 %v3749_v0, %s4283_s28 }
  0x27   : > { %2980 = vmatprep.mubr.msk.f32.mxu1 %vm595_vm1, %v574_v12  ;;  %3425 = vset.pattern.permute.xlu0 %v3604_v15  ;;  %v514_v31 = vadd.f32 %v513_v29, %v512_v27  ;;  %v526_v32 = vrot.slane %v525_v30, 2  ;;  %v695_v12 = vld [vmem:[%s4271_s4] sm:$0xff]  ;;  %v696_v27 = vld [vmem:[%s4271_s4 + $0x8] sm:$0xff] }
  0x28   : > { %3426 = vset.pattern.permute.xlu1 %v3604_v15  ;;  %698 = vperm.xlu0 %3425, %v3749_v0  }
  0x29   : > { %v515_v33 = vrot.slane %v514_v31, 1  ;;  %v527_v34 = vadd.f32 %v526_v32, %v525_v30  ;;  %2994 = vmatprep.mubr.msk.f32.mxu0 %vm705_vm2, %v695_v12 }
  0x2a   : > { %702 = vperm.xlu1 %3426, %v3761_v3  }
  0x2b   : > { %v516_v35 = vadd.f32 %v515_v33, %v514_v31  ;;  %v528_v36 = vrot.slane %v527_v34, 1 }
  0x2c   : > { %3428 = vset.pattern.permute.xlu0 %v3601_v2 }
  0x2d   : > { %v518_v37 = vmul.f32 0.041666668, %v516_v35  ;;  %v529_v38 = vadd.f32 %v528_v36, %v527_v34 }
  0x2e   : > { %3427 = vset.pattern.permute.xlu1 %v3601_v2 }
  0x2f   : > { %v530_v39 = vmul.f32 0.041666668, %v529_v38  ;;  %v534_v40 = vmul.f32 %v518_v37, %v518_v37  ;;  %v531_v43 = vsub.f32 %v398_v16, %v518_v37  ;;  %v532_v45 = vsub.f32 %v399_v17, %v518_v37 }
  0x30   : > { %v533_v50 = vsub.f32 %v400_v21, %v518_v37 }
  0x31   : > { %v535_v41 = vsub.f32 %v530_v39, %v534_v40 }
  0x33   : > { %v536_v42 = vadd.f32 1e-05, %v535_v41 }
  0x35   : > { %3512 = vrsqrt.f32 %v536_v42 }
  0x3f   : > { %v3513_v44 = vpop.eup %3512 }
  0x40   : > { %v538_v46 = vmul.f32 %v3513_v44, %v531_v43  ;;  %v539_v49 = vmul.f32 %v3513_v44, %v532_v45  ;;  %v540_v55 = vmul.f32 %v3513_v44, %v533_v50 }
  0x90   : > { %v561_v47 = vpop.permute.xlu1 %560  ;;  %v544_v48 = vpop.permute.xlu0 %543 }
  0x91   : > { %v556_v51 = vmul.f32 %v544_v48, %v538_v46  ;;  %v3606_v48 = vmov 7  }
  0x93   : > { %v571_v56 = vadd.f32 %v561_v47, %v556_v51 }
  0x94   : > { %v565_v52 = vpop.permute.xlu1 %564  ;;  %v549_v53 = vpop.permute.xlu0 %548 }
  0x95   : > { %v557_v54 = vmul.f32 %v549_v53, %v539_v49 }
  0x97   : > { %v572_v57 = vadd.f32 %v565_v52, %v557_v54 }
  0x98   : > { %v554_v58 = vpop.permute.xlu0 %553  ;;  %v569_v61 = vpop.permute.xlu1 %568 }
  0x99   : > { %v558_v59 = vmul.f32 %v554_v58, %v540_v55  ;;  %v3151_v60 = vpack.c.bf16 %v572_v57, %v571_v56 }
  0x9b   : > { %v573_v62 = vadd.f32 %v569_v61, %v558_v59  ;;  %3152 = vmatprep.subr.bf16.mxu1 %v3151_v60 }
  0x9c   : > { %3154 = vmatpush3.bf16.msra.mxu1 %v3151_v60 }
  0x9d   : > { %2978 = vmatprep.subr.mxu1 %v573_v62  ;;  %v584_v10 = vpop.permute.xlu1 %583 }
  0x9e   : > { %v580_v15 = vpop.permute.xlu0 %579 }
  0xa0   : > { %2979 = vmatpush3.msra.mxu1 %v573_v62 }
  0xa1   : > { %2981 = vmatmul.mubr.msk.f32.vlgmr.msra.gmra.mrb[4].mxu1 %vm595_vm1, %v575_v63  ;;  %v588_v11 = vpop.permute.xlu1 %587 }
  0xa2   : > { %2983 = vmatprep.mubr.msk.f32.mxu1 %vm595_vm1, %v576_v1  ;;  %v593_v20 = vpop.permute.xlu0 %592 }
  0xa5   : > { %2984 = vmatmul.mubr.msk.f32.gmra.mrb[6].mxu1 %vm595_vm1, %v577_v4  ;;  %v802_v13 = vpop.permute.xlu1 %801 }
  0xa6   : > { %3275 = vpush %v802_v13 }
  0xa7   : > { %v699_v29 = vpop.permute.xlu0 %698 }
  0xa9   : > { %v703_v30 = vpop.permute.xlu1 %702 }
  0xd7   : > { %s3276_s21 = spop %3275 }
  0xd8   : > { %v804_v36 = vstv %s3276_s21 }
  0xf5   : > { %v2970_v5 = vpop.f32.mrb[0].mxu1 }
  0xf6   : > { %v490_v7 = vpop.f32.mrb[1].mxu1  ;;  %794 = vperm.xlu0 %3428, %v2970_v5  }
  0xf7   : > { %789 = vperm.xlu1 %3427, %v490_v7  }
  0xf9   : > { %v3829_v8 = vpop.f32.mrb[2].mxu1 }
  0xfa   : > { %v3831_v9 = vpop.f32.mrb[3].mxu1  ;;  %3430 = vset.pattern.permute.xlu0 %v3605_v28 }
  0xfb   : > { %3429 = vset.pattern.permute.xlu1 %v3605_v28  ;;  %v880_v28 = vld [vmem:[%s4273_s6] sm:$0xff] }
  0xfc   : > { %3009 = vmatprep.mubr.msk.f32.mxu1 %vm890_vm5, %v880_v28 }
 0x174   : > { %v2982_v16 = vpop.f32.mrb[4].mxu1 }
 0x175   : > { %v3837_v17 = vadd.f32 %v2982_v16, %v584_v10  ;;  %v674_v18 = vpop.f32.mrb[5].mxu1  ;;  %v795_v34 = vpop.permute.xlu0 %794 }
 0x176   : > { %v3839_v19 = vadd.f32 %v674_v18, %v580_v15  ;;  %v790_v37 = vpop.permute.xlu1 %789 }
 0x178   : > { %v2985_v21 = vpop.f32.mrb[6].mxu1  ;;  %v3155_v22 = vpack.c.bf16 %v3837_v17, %v3839_v19 }
 0x179   : > { %v3843_v23 = vadd.f32 %v2985_v21, %v593_v20  ;;  %v684_v24 = vpop.f32.mrb[7].mxu1 }
 0x17a   : > { %v3845_v25 = vadd.f32 %v684_v24, %v588_v11  ;;  %3156 = vmatprep.subr.bf16.mxu0 %v3155_v22 }
 0x17b   : > { %3158 = vmatpush3.bf16.msra.mxu0 %v3155_v22 }
 0x17c   : > { %v3159_v26 = vpack.c.bf16 %v3843_v23, %v3845_v25 }
 0x17e   : > { %3160 = vmatprep.subr.bf16.mxu0 %v3159_v26 }
 0x17f   : > { %3162 = vmatpush3.bf16.msra.mxu0 %v3159_v26 }
 0x182   : > { %2995 = vmatmul.mubr.msk.f32.vlgmr.msra.gmra.mrb[0].mxu0 %vm705_vm2, %v696_v27 }
 0x255   : > { %v2996_v31 = vpop.f32.mrb[0].mxu0 }
 0x256   : > { %v784_v32 = vadd.f32 %v2996_v31, %v703_v30  ;;  %v778_v33 = vpop.f32.mrb[1].mxu0  ;;  %v3609_v30 = vmov 8   ;;  %v693_v31 = vlaneseq }
 0x257   : > { %v779_v35 = vadd.f32 %v778_v33, %v699_v29  ;;  %v974_v29 = vrot.slane %v3749_v0, 4 }
 0x258   : > { %v798_v38 = vadd.f32 %v795_v34, %v784_v32  ;;  %v3867_v32 = vand.u32 127, %v693_v31 }
 0x259   : > { %v797_v39 = vadd.f32 %v790_v37, %v779_v35 }
 0x25a   : > { %v807_v40 = vmul.f32 %v804_v36, %v798_v38  ;;  %vm800_vm3 = vcmp.ge.f32.partialorder %v798_v38, 0.0  ;;  %vm866_vm6 = vcmp.ge.s32.totalorder %v3867_v32, 1  ;;  %vm873_vm8 = vcmp.lt.s32.totalorder %v3867_v32, 127 }
 0x25b   : > { %v806_v41 = vmul.f32 %v804_v36, %v797_v39  ;;  %vm799_vm4 = vcmp.ge.f32.partialorder %v797_v39, 0.0  ;;  %vm3870_vm7 = vmpackc.low %vm866_vm6, %vm866_vm6  ;;  %vm1325_vm14 = vcmp.ge.s32.totalorder %v3867_v32, 2  ;;  %vm1332_vm1 = vcmp.lt.s32.totalorder %v3867_v32, 126  ;;  %v2802_v32 = vld [vmem:[%s4273_s6 + $0x18] sm:$0xff] }
 0x25c   : > { %v809_v42 = vsel %vm800_vm3, %v798_v38, %v807_v40  ;;  %vm3879_vm9 = vmpackc.low %vm873_vm8, %vm873_vm8 }
 0x25d   : > { %v808_v43 = vsel %vm799_vm4, %v797_v39, %v806_v41  ;;  %v822_v44 = vmul.f32 %v809_v42, %v809_v42  ;;  %vm3958_vm15 = vmpackc.low %vm1325_vm14, %vm1325_vm14 }
 0x25e   : > { %v810_v45 = vadd.f32 %v809_v42, %v808_v43  ;;  %v821_v46 = vmul.f32 %v808_v43, %v808_v43  ;;  %vm3967_vm3 = vmpackc.low %vm1332_vm1, %vm1332_vm1 }
 0x260   : > { %811 = vadd.xlane.f32.xlu1 %v810_v45  ;;  %v823_v47 = vadd.f32 %v822_v44, %v821_v46  ;;  %v881_v44 = vld [vmem:[%s4273_s6 + $0x8] sm:$0xff]  ;;  %v3610_v45 = vmov 9  }
 0x262   : > { %824 = vadd.xlane.f32.xlu0 %v823_v47 }
 0x271   : > { %847 = vperm.xlu1 %3429, %v3749_v0  }
 0x275   : > { %3431 = vset.pattern.permute.xlu1 %v3606_v48 }
 0x276   : > { %857 = vperm.xlu1 %3431, %v3749_v0  }
 0x278   : > { %851 = vperm.xlu0 %3430, %v3761_v3  }
 0x27a   : > { %861 = vperm.xlu1 %3431, %v3761_v3  }
 0x27c   : > { %3443 = vset.pattern.permute.xlu0 %v3610_v45 }
 0x27e   : > { %3442 = vset.pattern.permute.xlu1 %v3609_v30 }
 0x2ed   : > { %v812_v49 = vpop.xlane.xlu1 %811 }
 0x2ee   : > { %v813_v50 = vrot.slane %v812_v49, 4 }
 0x2ef   : > { %v825_v51 = vpop.xlane.xlu0 %824 }
 0x2f0   : > { %v814_v52 = vadd.f32 %v813_v50, %v812_v49  ;;  %v826_v53 = vrot.slane %v825_v51, 4 }
 0x2f1   : > { %v848_v4 = vpop.permute.xlu1 %847 }
 0x2f2   : > { %v827_v54 = vadd.f32 %v826_v53, %v825_v51  ;;  %v815_v55 = vrot.slane %v814_v52, 2 }
 0x2f4   : > { %v828_v56 = vrot.slane %v827_v54, 2  ;;  %v816_v57 = vadd.f32 %v815_v55, %v814_v52 }
 0x2f5   : > { %v858_v7 = vpop.permute.xlu1 %857 }
 0x2f6   : > { %v817_v58 = vrot.slane %v816_v57, 1  ;;  %v829_v59 = vadd.f32 %v828_v56, %v827_v54 }
 0x2f7   : > { %v852_v13 = vpop.permute.xlu0 %851 }
 0x2f8   : > { %v818_v60 = vadd.f32 %v817_v58, %v816_v57  ;;  %v830_v61 = vrot.slane %v829_v59, 1 }
 0x2f9   : > { %v862_v21 = vpop.permute.xlu1 %861 }
 0x2fa   : > { %3277 = vpush %v818_v60  ;;  %v831_v62 = vadd.f32 %v830_v61, %v829_v59  ;;  %v3611_v61 = vmov 10  }
 0x2fc   : > { %3279 = vpush %v831_v62 }
 0x32b   : > { %s3278_s25 = spop %3277 }
 0x32c   : > { %s820_s26 = smul.f32 0.00048828125, %s3278_s25  ;;  %s4282_s25 = smov 1  }
 0x32d   : > { %s3280_s30 = spop %3279 }
 0x32e   : > { %s834_s11 = smul.f32 %s820_s26, %s820_s26  ;;  %v836_v5 = vstv %s820_s26 }
 0x32f   : > { %s833_s12 = smul.f32 0.00048828125, %s3280_s30  ;;  %v837_v10 = vsub.f32 %v808_v43, %v836_v5  ;;  %v838_v11 = vsub.f32 %v809_v42, %v836_v5 }
 0x331   : > { %s835_s18 = ssub.f32 %s833_s12, %s834_s11  ;;  %s4279_s11 = smov 127  }
 0x333   : > { %s839_s20 = sadd.f32 1e-05, %s835_s18 }
 0x335   : > { %v840_v63 = vstv %s839_s20 }
 0x336   : > { %3514 = vrsqrt.f32 %v840_v63 }
 0x340   : > { %v3515_v1 = vpop.eup %3514 }
 0x341   : > { %3281 = vpush %v3515_v1 }
 0x372   : > { %s3282_s21 = spop %3281 }
 0x373   : > { %v843_v12 = vstv %s3282_s21 }
 0x374   : > { %v844_v15 = vmul.f32 %v843_v12, %v837_v10  ;;  %v845_v16 = vmul.f32 %v843_v12, %v838_v11 }
 0x376   : > { %v854_v18 = vmul.f32 %v848_v4, %v844_v15  ;;  %v855_v20 = vmul.f32 %v852_v13, %v845_v16 }
 0x378   : > { %v864_v22 = vadd.f32 %v858_v7, %v854_v18  ;;  %v865_v24 = vadd.f32 %v862_v21, %v855_v20  ;;  %v1040_v21 = vld [vmem:[%s4274_s7] sm:$0xff] }
 0x379   : > { %3016 = vmatprep.mubr.msk.f32.mxu0 %vm411_vm0, %v1040_v21 }
 0x37a   : > { %v3432_v26 = vpack.i.bf16 %v865_v24, %v864_v22  ;;  %v3169_v27 = vpack.c.bf16 %v865_v24, %v864_v22  ;;  %v3612_v22 = vmov 11  }
 0x37c   : > { %3433 = vrot.lane.b32.xlu1 %v3432_v26, %s4282_s25 }
 0x380   : > { %3438 = vrot.lane.b32.xlu1 %v3432_v26, %s4279_s11 }
 0x384   : > { %975 = vrot.lane.b32.xlu1 %v974_v29, %s4283_s28 }
 0x388   : > { %883 = vperm.xlu1 %3442, %v3749_v0  }
 0x38c   : > { %887 = vperm.xlu1 %3442, %v3761_v3  }
 0x390   : > { %3444 = vset.pattern.permute.xlu1 %v3610_v45  ;;  %v1041_v45 = vld [vmem:[%s4274_s7 + $0x8] sm:$0xff] }
 0x3ee   : > { %v3434_v33 = vpop.permute.xlu1 %3433 }
 0x3ef   : > { %v3436_v34 = vunpack.i.h.bf16 %v3434_v33  ;;  %v3435_v35 = vunpack.i.l.bf16 %v3434_v33 }
 0x3f1   : > { %v3163_v37 = vpack.c.bf16 %v3436_v34, %v3435_v35 }
 0x3f2   : > { %v3439_v38 = vpop.permute.xlu1 %3438 }
 0x3f3   : > { %v3441_v39 = vunpack.i.h.bf16 %v3439_v38  ;;  %v3440_v40 = vunpack.i.l.bf16 %v3439_v38  ;;  %3165 = vmatprep.subr.msk.bf16.mxu1 %vm3870_vm7, %v3163_v37 }
 0x3f4   : > { %3168 = vmatpush3.bf16.msk.msra.mxu1 %vm3870_vm7, %v3163_v37 }
 0x3f5   : > { %3170 = vmatprep.subr.bf16.mxu1 %v3169_v27  ;;  %v3173_v43 = vpack.c.bf16 %v3441_v39, %v3440_v40 }
 0x3f6   : > { %v976_v42 = vpop.permute.xlu1 %975 }
 0x3f7   : > { %3283 = vpush %v976_v42 }
 0x3f8   : > { %3172 = vmatpush3.bf16.msra.mxu1 %v3169_v27 }
 0x3f9   : > { %3175 = vmatprep.subr.msk.bf16.mxu1 %vm3879_vm9, %v3173_v43 }
 0x3fc   : > { %3178 = vmatpush3.bf16.msk.msra.mxu1 %vm3879_vm9, %v3173_v43 }
 0x3ff   : > { %3010 = vmatmul.mubr.msk.f32.vlgmr.msra.gmra.mrb[8].mxu1 %vm890_vm5, %v881_v44 }
 0x407   : > { %v884_v46 = vpop.permute.xlu1 %883 }
 0x40b   : > { %v888_v47 = vpop.permute.xlu1 %887 }
 0x428   : > { %s3284_s20 = spop %3283 }
 0x429   : > { %v978_v49 = vstv %s3284_s20 }
 0x4d2   : > { %v3011_v48 = vpop.f32.mrb[8].mxu1 }
 0x4d3   : > { %v969_v50 = vadd.f32 %v3011_v48, %v888_v47  ;;  %v963_v51 = vpop.f32.mrb[9].mxu1  ;;  %v1043_v47 = vld [vmem:[%s4274_s7 + $0x18] sm:$0xff]  ;;  %v2797_v48 = vld [vmem:[%s4271_s4 + $0x10] sm:$0xff] }
 0x4d4   : > { %v964_v52 = vadd.f32 %v963_v51, %v884_v46  ;;  %v1042_v46 = vld [vmem:[%s4274_s7 + $0x10] sm:$0xff] }
 0x4d5   : > { %vm973_vm10 = vcmp.ge.f32.partialorder %v969_v50, 0.0  ;;  %v981_v53 = vmul.f32 %v978_v49, %v969_v50 }
 0x4d6   : > { %vm972_vm11 = vcmp.ge.f32.partialorder %v964_v52, 0.0  ;;  %v980_v54 = vmul.f32 %v978_v49, %v964_v52  ;;  %v1259_v49 = vrot.slane %v3749_v0, 1 }
 0x4d7   : > { %v983_v55 = vsel %vm973_vm10, %v969_v50, %v981_v53  ;;  %v3613_v50 = vmov 12  }
 0x4d8   : > { %v982_v56 = vsel %vm972_vm11, %v964_v52, %v980_v54  ;;  %v996_v57 = vmul.f32 %v983_v55, %v983_v55 }
 0x4d9   : > { %v984_v58 = vadd.f32 %v983_v55, %v982_v56  ;;  %v995_v59 = vmul.f32 %v982_v56, %v982_v56 }
 0x4db   : > { %985 = vadd.xlane.f32.xlu1 %v984_v58  ;;  %v997_v60 = vadd.f32 %v996_v57, %v995_v59 }
 0x4dd   : > { %998 = vadd.xlane.f32.xlu0 %v997_v60 }
 0x4ec   : > { %1025 = vperm.xlu1 %3444, %v3761_v3  }
 0x4f0   : > { %3445 = vset.pattern.permute.xlu1 %v3611_v61 }
 0x4f1   : > { %1031 = vperm.xlu1 %3445, %v3749_v0  }
 0x4f3   : > { %1021 = vperm.xlu0 %3443, %v3749_v0  }
 0x4f5   : > { %1035 = vperm.xlu1 %3445, %v3761_v3  }
 0x4f7   : > { %3448 = vset.pattern.permute.xlu0 %v3613_v50 }
 0x4f8   : > { %1260 = vrot.lane.b32.xlu0 %v1259_v49, %s4283_s28 }
 0x4f9   : > { %3446 = vset.pattern.permute.xlu1 %v3612_v22 }
 0x4fa   : > { %1146 = vperm.xlu1 %3446, %v3749_v0  }
 0x4fc   : > { %1173 = vperm.xlu0 %3448, %v3761_v3  }
 0x4fe   : > { %1150 = vperm.xlu1 %3446, %v3761_v3  }
 0x502   : > { %1154 = vperm.xlu1 %3446, %v3772_v6  }
 0x506   : > { %1158 = vperm.xlu1 %3446, %v3801_v14  }
 0x50a   : > { %3447 = vset.pattern.permute.xlu1 %v3613_v50 }
 0x50b   : > { %1169 = vperm.xlu1 %3447, %v3749_v0  }
 0x568   : > { %v986_v62 = vpop.xlane.xlu1 %985 }
 0x569   : > { %v987_v63 = vrot.slane %v986_v62, 4 }
 0x56a   : > { %v999_v1 = vpop.xlane.xlu0 %998 }
 0x56b   : > { %v988_v4 = vadd.f32 %v987_v63, %v986_v62  ;;  %v1000_v5 = vrot.slane %v999_v1, 4 }
 0x56c   : > { %v1026_v27 = vpop.permute.xlu1 %1025 }
 0x56d   : > { %v1001_v7 = vadd.f32 %v1000_v5, %v999_v1  ;;  %v989_v10 = vrot.slane %v988_v4, 2 }
 0x56f   : > { %v1002_v11 = vrot.slane %v1001_v7, 2  ;;  %v990_v12 = vadd.f32 %v989_v10, %v988_v4 }
 0x570   : > { %v1032_v29 = vpop.permute.xlu1 %1031 }
 0x571   : > { %v991_v13 = vrot.slane %v990_v12, 1  ;;  %v1003_v15 = vadd.f32 %v1002_v11, %v1001_v7 }
 0x572   : > { %v1022_v34 = vpop.permute.xlu0 %1021 }
 0x573   : > { %v992_v16 = vadd.f32 %v991_v13, %v990_v12  ;;  %v1004_v18 = vrot.slane %v1003_v15, 1 }
 0x574   : > { %v1036_v40 = vpop.permute.xlu1 %1035 }
 0x575   : > { %3285 = vpush %v992_v16  ;;  %v1005_v20 = vadd.f32 %v1004_v18, %v1003_v15 }
 0x576   : > { %v1261_v61 = vpop.permute.xlu0 %1260 }
 0x577   : > { %3287 = vpush %v1005_v20 }
 0x579   : > { %v1147_v51 = vpop.permute.xlu1 %1146 }
 0x57b   : > { %v1174_v10 = vpop.permute.xlu0 %1173 }
 0x57d   : > { %v1151_v52 = vpop.permute.xlu1 %1150 }
 0x581   : > { %v1155_v53 = vpop.permute.xlu1 %1154 }
 0x585   : > { %v1159_v1 = vpop.permute.xlu1 %1158 }
 0x58a   : > { %v1170_v11 = vpop.permute.xlu1 %1169 }
 0x5a6   : > { %s3286_s26 = spop %3285 }
 0x5a7   : > { %s994_s12 = smul.f32 0.00048828125, %s3286_s26 }
 0x5a8   : > { %s3288_s18 = spop %3287 }
 0x5a9   : > { %s1008_s20 = smul.f32 %s994_s12, %s994_s12  ;;  %v1010_v28 = vstv %s994_s12 }
 0x5aa   : > { %s1007_s29 = smul.f32 0.00048828125, %s3288_s18  ;;  %v1011_v30 = vsub.f32 %v982_v56, %v1010_v28  ;;  %v1012_v31 = vsub.f32 %v983_v55, %v1010_v28 }
 0x5ac   : > { %s1009_s11 = ssub.f32 %s1007_s29, %s1008_s20 }
 0x5ae   : > { %s1013_s21 = sadd.f32 1e-05, %s1009_s11 }
 0x5b0   : > { %v1014_v24 = vstv %s1013_s21 }
 0x5b1   : > { %3516 = vrsqrt.f32 %v1014_v24 }
 0x5bb   : > { %v3517_v26 = vpop.eup %3516 }
 0x5bc   : > { %3289 = vpush %v3517_v26 }
 0x5bd   : > { %3291 = vpush %v1261_v61 }
 0x5ed   : > { %s3290_s30 = spop %3289 }
 0x5ee   : > { %v1017_v33 = vstv %s3290_s30  ;;  %s3292_s26 = spop %3291 }
 0x5ef   : > { %v1018_v35 = vmul.f32 %v1017_v33, %v1011_v30  ;;  %v1019_v37 = vmul.f32 %v1017_v33, %v1012_v31  ;;  %v1263_v13 = vstv %s3292_s26  ;;  %v3615_v30 = vmov 14  }
 0x5f1   : > { %v1029_v38 = vmul.f32 %v1026_v27, %v1019_v37  ;;  %v1028_v39 = vmul.f32 %v1022_v34, %v1018_v35 }
 0x5f3   : > { %v1038_v42 = vadd.f32 %v1032_v29, %v1028_v39  ;;  %v1039_v43 = vadd.f32 %v1036_v40, %v1029_v38 }
 0x5f5   : > { %v3179_v44 = vpack.c.bf16 %v1039_v43, %v1038_v42 }
 0x5f7   : > { %3180 = vmatprep.subr.bf16.mxu0 %v3179_v44 }
 0x5f8   : > { %3182 = vmatpush3.bf16.msra.mxu0 %v3179_v44 }
 0x5fb   : > { %3017 = vmatmul.mubr.msk.f32.vlgmr.msra.gmra.mrb[2].mxu0 %vm411_vm0, %v1041_v45 }
 0x5fc   : > { %3019 = vmatprep.mubr.msk.f32.mxu0 %vm411_vm0, %v1042_v46 }
 0x5ff   : > { %3020 = vmatmul.mubr.msk.f32.gmra.mrb[4].mxu0 %vm411_vm0, %v1043_v47 }
 0x600   : > { %3030 = vmatprep.mubr.msk.f32.mxu0 %vm705_vm2, %v2797_v48 }
 0x6ce   : > { %v3018_v54 = vpop.f32.mrb[2].mxu0 }
 0x6cf   : > { %v1142_v55 = vadd.f32 %v3018_v54, %v3837_v17  ;;  %v1122_v56 = vpop.f32.mrb[3].mxu0 }
 0x6d0   : > { %v1141_v57 = vadd.f32 %v1122_v56, %v3839_v19 }
 0x6d1   : > { %v3925_v58 = vadd.f32 %v1151_v52, %v1142_v55 }
 0x6d2   : > { %v3927_v59 = vadd.f32 %v1147_v51, %v1141_v57  ;;  %v3021_v60 = vpop.f32.mrb[4].mxu0 }
 0x6d3   : > { %v1144_v62 = vadd.f32 %v3021_v60, %v3843_v23  ;;  %v1132_v63 = vpop.f32.mrb[5].mxu0  ;;  %v2798_v23 = vld [vmem:[%s4271_s4 + $0x18] sm:$0xff] }
 0x6d4   : > { %v1143_v4 = vadd.f32 %v1132_v63, %v3845_v25  ;;  %v3183_v5 = vpack.c.bf16 %v3925_v58, %v3927_v59  ;;  %v3614_v25 = vmov 13  }
 0x6d5   : > { %v3933_v17 = vadd.f32 %v1159_v1, %v1144_v62  ;;  %3449 = vset.pattern.permute.xlu1 %v3614_v25  ;;  %3450 = vset.pattern.permute.xlu0 %v3614_v25  ;;  %v1433_v25 = vrot.slane %v3749_v0, 5 }
 0x6d6   : > { %v3935_v7 = vadd.f32 %v1155_v53, %v1143_v4  ;;  %3184 = vmatprep.subr.bf16.mxu0 %v3183_v5 }
 0x6d7   : > { %3186 = vmatpush3.bf16.msra.mxu0 %v3183_v5 }
 0x6d8   : > { %v3187_v19 = vpack.c.bf16 %v3933_v17, %v3935_v7 }
 0x6da   : > { %3188 = vmatprep.subr.bf16.mxu0 %v3187_v19 }
 0x6db   : > { %3190 = vmatpush3.bf16.msra.mxu0 %v3187_v19 }
 0x6de   : > { %3031 = vmatmul.mubr.msk.f32.vlgmr.msra.gmra.mrb[6].mxu0 %vm705_vm2, %v2798_v23  ;;  %v2801_v23 = vld [vmem:[%s4273_s6 + $0x10] sm:$0xff] }
 0x6df   : > { %3045 = vmatprep.mubr.msk.f32.mxu1 %vm890_vm5, %v2801_v23 }
 0x7b1   : > { %v3032_v12 = vpop.f32.mrb[6].mxu0 }
 0x7b2   : > { %v1254_v15 = vadd.f32 %v3032_v12, %v1174_v10  ;;  %v1248_v16 = vpop.f32.mrb[7].mxu0  ;;  %v3618_v10 = vmov 15  }
 0x7b3   : > { %v1249_v18 = vadd.f32 %v1248_v16, %v1170_v11 }
 0x7b4   : > { %vm1258_vm12 = vcmp.ge.f32.partialorder %v1254_v15, 0.0  ;;  %v1266_v20 = vmul.f32 %v1263_v13, %v1254_v15 }
 0x7b5   : > { %v1265_v21 = vmul.f32 %v1263_v13, %v1249_v18  ;;  %vm1257_vm13 = vcmp.ge.f32.partialorder %v1249_v18, 0.0 }
 0x7b6   : > { %v1268_v22 = vsel %vm1258_vm12, %v1254_v15, %v1266_v20 }
 0x7b7   : > { %v1267_v24 = vsel %vm1257_vm13, %v1249_v18, %v1265_v21  ;;  %v1281_v26 = vmul.f32 %v1268_v22, %v1268_v22 }
 0x7b8   : > { %v1269_v27 = vadd.f32 %v1268_v22, %v1267_v24  ;;  %v1280_v28 = vmul.f32 %v1267_v24, %v1267_v24 }
 0x7ba   : > { %1270 = vadd.xlane.f32.xlu1 %v1269_v27  ;;  %v1282_v29 = vadd.f32 %v1281_v26, %v1280_v28  ;;  %v3619_v26 = vmov 16  }
 0x7bc   : > { %1283 = vadd.xlane.f32.xlu0 %v1282_v29 }
 0x7cb   : > { %1306 = vperm.xlu1 %3449, %v3749_v0  }
 0x7cf   : > { %3451 = vset.pattern.permute.xlu1 %v3615_v30 }
 0x7d0   : > { %1316 = vperm.xlu1 %3451, %v3749_v0  }
 0x7d2   : > { %1310 = vperm.xlu0 %3450, %v3761_v3  }
 0x7d4   : > { %1320 = vperm.xlu1 %3451, %v3761_v3  }
 0x7d6   : > { %3463 = vset.pattern.permute.xlu0 %v3619_v26 }
 0x7d8   : > { %3462 = vset.pattern.permute.xlu1 %v3618_v10 }
 0x847   : > { %v1271_v31 = vpop.xlane.xlu1 %1270 }
 0x848   : > { %v1272_v33 = vrot.slane %v1271_v31, 4 }
 0x849   : > { %v1284_v34 = vpop.xlane.xlu0 %1283 }
 0x84a   : > { %v1273_v35 = vadd.f32 %v1272_v33, %v1271_v31  ;;  %v1285_v37 = vrot.slane %v1284_v34, 4 }
 0x84b   : > { %v1307_v50 = vpop.permute.xlu1 %1306 }
 0x84c   : > { %v1286_v38 = vadd.f32 %v1285_v37, %v1284_v34  ;;  %v1274_v39 = vrot.slane %v1273_v35, 2 }
 0x84e   : > { %v1287_v40 = vrot.slane %v1286_v38, 2  ;;  %v1275_v42 = vadd.f32 %v1274_v39, %v1273_v35 }
 0x84f   : > { %v1317_v52 = vpop.permute.xlu1 %1316 }
 0x850   : > { %v1276_v43 = vrot.slane %v1275_v42, 1  ;;  %v1288_v44 = vadd.f32 %v1287_v40, %v1286_v38 }
 0x851   : > { %v1311_v56 = vpop.permute.xlu0 %1310 }
 0x852   : > { %v1277_v45 = vadd.f32 %v1276_v43, %v1275_v42  ;;  %v1289_v46 = vrot.slane %v1288_v44, 1 }
 0x853   : > { %v1321_v63 = vpop.permute.xlu1 %1320 }
 0x854   : > { %3293 = vpush %v1277_v45  ;;  %v1290_v47 = vadd.f32 %v1289_v46, %v1288_v44  ;;  %v3620_v45 = vmov 17   ;;  %v3983_v46 = vld [vmem:[%s4276_s9] sm:$0xff] }
 0x856   : > { %3295 = vpush %v1290_v47  ;;  %v3621_v47 = vmov 19  }
 0x885   : > { %s3294_s12 = spop %3293 }
 0x886   : > { %s1279_s18 = smul.f32 0.00048828125, %s3294_s12  ;;  %s4281_s12 = smov 2  }
 0x887   : > { %s3296_s20 = spop %3295 }
 0x888   : > { %s1293_s21 = smul.f32 %s1279_s18, %s1279_s18  ;;  %v1295_v51 = vstv %s1279_s18 }
 0x889   : > { %s1292_s30 = smul.f32 0.00048828125, %s3296_s20  ;;  %v1296_v53 = vsub.f32 %v1267_v24, %v1295_v51  ;;  %v1297_v54 = vsub.f32 %v1268_v22, %v1295_v51 }
 0x88b   : > { %s1294_s29 = ssub.f32 %s1292_s30, %s1293_s21  ;;  %s4280_s21 = smov 126  }
 0x88d   : > { %s1298_s11 = sadd.f32 1e-05, %s1294_s29 }
 0x88f   : > { %v1299_v48 = vstv %s1298_s11 }
 0x890   : > { %3518 = vrsqrt.f32 %v1299_v48  ;;  %v3622_v48 = vmov 18  }
 0x89a   : > { %v3519_v49 = vpop.eup %3518 }
 0x89b   : > { %3297 = vpush %v3519_v49  ;;  %v3992_v49 = vld [vmem:[%s4276_s9 + $0x8] sm:$0xff] }
 0x8cc   : > { %s3298_s26 = spop %3297 }
 0x8cd   : > { %v1302_v55 = vstv %s3298_s26 }
 0x8ce   : > { %v1303_v57 = vmul.f32 %v1302_v55, %v1296_v53  ;;  %v1304_v60 = vmul.f32 %v1302_v55, %v1297_v54 }
 0x8d0   : > { %v1313_v61 = vmul.f32 %v1307_v50, %v1303_v57  ;;  %v1314_v62 = vmul.f32 %v1311_v56, %v1304_v60 }
 0x8d2   : > { %v1323_v1 = vadd.f32 %v1317_v52, %v1313_v61  ;;  %v1324_v4 = vadd.f32 %v1321_v63, %v1314_v62 }
 0x8d4   : > { %v3452_v5 = vpack.i.bf16 %v1324_v4, %v1323_v1  ;;  %v3197_v19 = vpack.c.bf16 %v1324_v4, %v1323_v1 }
 0x8d6   : > { %3453 = vrot.lane.b32.xlu1 %v3452_v5, %s4281_s12 }
 0x8da   : > { %3458 = vrot.lane.b32.xlu1 %v3452_v5, %s4280_s21 }
 0x8de   : > { %1434 = vrot.lane.b32.xlu1 %v1433_v25, %s4283_s28 }
 0x8e2   : > { %1343 = vperm.xlu1 %3462, %v3749_v0  }
 0x8e6   : > { %1347 = vperm.xlu1 %3462, %v3761_v3  }
 0x8ea   : > { %3464 = vset.pattern.permute.xlu1 %v3619_v26  ;;  %v2817_v26 = vld [vmem:[%s4271_s4 + $0x20] sm:$0xff] }
 0x948   : > { %v3454_v11 = vpop.permute.xlu1 %3453 }
 0x949   : > { %v3456_v12 = vunpack.i.h.bf16 %v3454_v11  ;;  %v3455_v13 = vunpack.i.l.bf16 %v3454_v11 }
 0x94b   : > { %v3191_v16 = vpack.c.bf16 %v3456_v12, %v3455_v13 }
 0x94c   : > { %v3459_v18 = vpop.permute.xlu1 %3458 }
 0x94d   : > { %v3461_v20 = vunpack.i.h.bf16 %v3459_v18  ;;  %v3460_v21 = vunpack.i.l.bf16 %v3459_v18  ;;  %3193 = vmatprep.subr.msk.bf16.mxu1 %vm3958_vm15, %v3191_v16 }
 0x94e   : > { %3196 = vmatpush3.bf16.msk.msra.mxu1 %vm3958_vm15, %v3191_v16 }
 0x94f   : > { %3198 = vmatprep.subr.bf16.mxu1 %v3197_v19  ;;  %v3201_v24 = vpack.c.bf16 %v3461_v20, %v3460_v21 }
 0x950   : > { %v1435_v22 = vpop.permute.xlu1 %1434 }
 0x951   : > { %3299 = vpush %v1435_v22  ;;  %v2810_v22 = vld [vmem:[%s4274_s7 + $0x28] sm:$0xff] }
 0x952   : > { %3200 = vmatpush3.bf16.msra.mxu1 %v3197_v19 }
 0x953   : > { %3203 = vmatprep.subr.msk.bf16.mxu1 %vm3967_vm3, %v3201_v24 }
 0x956   : > { %3206 = vmatpush3.bf16.msk.msra.mxu1 %vm3967_vm3, %v3201_v24  ;;  %v2811_v24 = vld [vmem:[%s4274_s7 + $0x30] sm:$0xff] }
 0x959   : > { %3046 = vmatmul.mubr.msk.f32.vlgmr.msra.gmra.mrb[10].mxu1 %vm890_vm5, %v2802_v32  ;;  %v2812_v32 = vld [vmem:[%s4274_s7 + $0x38] sm:$0xff] }
 0x961   : > { %v1344_v27 = vpop.permute.xlu1 %1343 }
 0x965   : > { %v1348_v28 = vpop.permute.xlu1 %1347 }
 0x982   : > { %s3300_s11 = spop %3299 }
 0x983   : > { %v1437_v30 = vstv %s3300_s11 }
 0xa2c   : > { %v3047_v29 = vpop.f32.mrb[10].mxu1 }
 0xa2d   : > { %v1428_v31 = vadd.f32 %v3047_v29, %v1348_v28  ;;  %v1422_v33 = vpop.f32.mrb[11].mxu1 }
 0xa2e   : > { %v1423_v34 = vadd.f32 %v1422_v33, %v1344_v27  ;;  %v1731_v27 = vrot.slane %v3983_v46, 2 }
 0xa2f   : > { %vm1432_vm4 = vcmp.ge.f32.partialorder %v1428_v31, 0.0  ;;  %v1440_v35 = vmul.f32 %v1437_v30, %v1428_v31 }
 0xa30   : > { %vm1431_vm6 = vcmp.ge.f32.partialorder %v1423_v34, 0.0  ;;  %v1439_v37 = vmul.f32 %v1437_v30, %v1423_v34 }
 0xa31   : > { %v1442_v38 = vsel %vm1432_vm4, %v1428_v31, %v1440_v35 }
 0xa32   : > { %v1441_v39 = vsel %vm1431_vm6, %v1423_v34, %v1439_v37  ;;  %v1455_v40 = vmul.f32 %v1442_v38, %v1442_v38 }
 0xa33   : > { %v1443_v42 = vadd.f32 %v1442_v38, %v1441_v39  ;;  %v1454_v43 = vmul.f32 %v1441_v39, %v1441_v39 }
 0xa35   : > { %1444 = vadd.xlane.f32.xlu1 %v1443_v42  ;;  %v1456_v44 = vadd.f32 %v1455_v40, %v1454_v43 }
 0xa37   : > { %1457 = vadd.xlane.f32.xlu0 %v1456_v44 }
 0xa46   : > { %1484 = vperm.xlu1 %3464, %v3761_v3  }
 0xa4a   : > { %3465 = vset.pattern.permute.xlu1 %v3620_v45 }
 0xa4b   : > { %1490 = vperm.xlu1 %3465, %v3983_v46  }
 0xa4d   : > { %1480 = vperm.xlu0 %3463, %v3983_v46  }
 0xa4f   : > { %1494 = vperm.xlu1 %3465, %v3761_v3  }
 0xa51   : > { %3468 = vset.pattern.permute.xlu0 %v3621_v47 }
 0xa52   : > { %1732 = vrot.lane.b32.xlu0 %v1731_v27, %s4283_s28 }
 0xa53   : > { %3466 = vset.pattern.permute.xlu1 %v3622_v48 }
 0xa54   : > { %1606 = vperm.xlu1 %3466, %v3983_v46  }
 0xa56   : > { %1633 = vperm.xlu0 %3468, %v3992_v49  }
 0xa58   : > { %1610 = vperm.xlu1 %3466, %v3992_v49  }
 0xa5c   : > { %1614 = vperm.xlu1 %3466, %v3772_v6  }
 0xa60   : > { %1618 = vperm.xlu1 %3466, %v3801_v14  }
 0xa64   : > { %3467 = vset.pattern.permute.xlu1 %v3621_v47 }
 0xa65   : > { %1629 = vperm.xlu1 %3467, %v3983_v46  }
 0xa69   : > { %3469 = vset.pattern.permute.xlu1 %v3601_v2  ;;  %v2809_v2 = vld [vmem:[%s4274_s7 + $0x20] sm:$0xff] }
 0xa6a   : > { %1719 = vperm.xlu1 %3469, %v3831_v9   ;;  %3052 = vmatprep.mubr.msk.f32.mxu0 %vm411_vm0, %v2809_v2 }
 0xa6e   : > { %1724 = vperm.xlu1 %3469, %v3829_v8  }
 0xac2   : > { %v1445_v3 = vpop.xlane.xlu1 %1444 }
 0xac3   : > { %v1446_v50 = vrot.slane %v1445_v3, 4 }
 0xac4   : > { %v1458_v51 = vpop.xlane.xlu0 %1457 }
 0xac5   : > { %v1447_v52 = vadd.f32 %v1446_v50, %v1445_v3  ;;  %v1459_v53 = vrot.slane %v1458_v51, 4 }
 0xac6   : > { %v1485_v63 = vpop.permute.xlu1 %1484 }
 0xac7   : > { %v1448_v54 = vrot.slane %v1447_v52, 2  ;;  %v1460_v55 = vadd.f32 %v1459_v53, %v1458_v51 }
 0xac9   : > { %v1461_v56 = vrot.slane %v1460_v55, 2  ;;  %v1449_v6 = vadd.f32 %v1448_v54, %v1447_v52 }
 0xaca   : > { %v1491_v4 = vpop.permute.xlu1 %1490 }
 0xacb   : > { %v1450_v57 = vrot.slane %v1449_v6, 1  ;;  %v1462_v14 = vadd.f32 %v1461_v56, %v1460_v55 }
 0xacc   : > { %v1481_v25 = vpop.permute.xlu0 %1480 }
 0xacd   : > { %v1451_v60 = vadd.f32 %v1450_v57, %v1449_v6  ;;  %v1463_v61 = vrot.slane %v1462_v14, 1 }
 0xace   : > { %v1495_v16 = vpop.permute.xlu1 %1494 }
 0xacf   : > { %3301 = vpush %v1451_v60  ;;  %v1464_v62 = vadd.f32 %v1463_v61, %v1462_v14 }
 0xad0   : > { %v1733_v40 = vpop.permute.xlu0 %1732 }
 0xad1   : > { %3303 = vpush %v1464_v62 }
 0xad3   : > { %v1607_v28 = vpop.permute.xlu1 %1606 }
 0xad5   : > { %v1634_v51 = vpop.permute.xlu0 %1633 }
 0xad7   : > { %v1611_v29 = vpop.permute.xlu1 %1610 }
 0xadb   : > { %v1615_v30 = vpop.permute.xlu1 %1614 }
 0xadf   : > { %v1619_v44 = vpop.permute.xlu1 %1618 }
 0xae4   : > { %v1630_v3 = vpop.permute.xlu1 %1629 }
 0xae9   : > { %v1720_v50 = vpop.permute.xlu1 %1719 }
 0xaed   : > { %v1725_v55 = vpop.permute.xlu1 %1724 }
 0xb00   : > { %s3302_s26 = spop %3301 }
 0xb01   : > { %s1453_s20 = smul.f32 0.00048828125, %s3302_s26 }
 0xb02   : > { %s3304_s18 = spop %3303 }
 0xb03   : > { %s1467_s30 = smul.f32 %s1453_s20, %s1453_s20  ;;  %v1469_v1 = vstv %s1453_s20 }
 0xb04   : > { %s1466_s21 = smul.f32 0.00048828125, %s3304_s18  ;;  %v1470_v5 = vsub.f32 %v1441_v39, %v1469_v1  ;;  %v1471_v19 = vsub.f32 %v1442_v38, %v1469_v1 }
 0xb06   : > { %s1468_s12 = ssub.f32 %s1466_s21, %s1467_s30 }
 0xb08   : > { %s1472_s25 = sadd.f32 1e-05, %s1468_s12 }
 0xb0a   : > { %v1473_v8 = vstv %s1472_s25 }
 0xb0b   : > { %3520 = vrsqrt.f32 %v1473_v8 }
 0xb15   : > { %v3521_v9 = vpop.eup %3520 }
 0xb16   : > { %3305 = vpush %v3521_v9 }
 0xb17   : > { %3307 = vpush %v1733_v40 }
 0xb47   : > { %s3306_s29 = spop %3305 }
 0xb48   : > { %v1476_v23 = vstv %s3306_s29  ;;  %s3308_s12 = spop %3307 }
 0xb49   : > { %v1477_v10 = vmul.f32 %v1476_v23, %v1470_v5  ;;  %v1478_v11 = vmul.f32 %v1476_v23, %v1471_v19  ;;  %v1735_v6 = vstv %s3308_s12  ;;  %s4297_s12 = smov 1  }
 0xb4b   : > { %v1488_v12 = vmul.f32 %v1485_v63, %v1478_v11  ;;  %v1487_v13 = vmul.f32 %v1481_v25, %v1477_v10 }
 0xb4d   : > { %v1498_v18 = vadd.f32 %v1495_v16, %v1488_v12  ;;  %v1497_v20 = vadd.f32 %v1491_v4, %v1487_v13  ;;  %v3624_v4 = vmov 21  }
 0xb4f   : > { %v3207_v21 = vpack.c.bf16 %v1498_v18, %v1497_v20 }
 0xb51   : > { %3208 = vmatprep.subr.bf16.mxu0 %v3207_v21 }
 0xb52   : > { %3210 = vmatpush3.bf16.msra.mxu0 %v3207_v21 }
 0xb55   : > { %3053 = vmatmul.mubr.msk.f32.vlgmr.msra.gmra.mrb[8].mxu0 %vm411_vm0, %v2810_v22 }
 0xb56   : > { %3055 = vmatprep.mubr.msk.f32.mxu0 %vm411_vm0, %v2811_v24 }
 0xb59   : > { %3056 = vmatmul.mubr.msk.f32.gmra.mrb[10].mxu0 %vm411_vm0, %v2812_v32 }
 0xb5a   : > { %3066 = vmatprep.mubr.msk.f32.mxu0 %vm705_vm2, %v2817_v26 }
 0xc28   : > { %v3054_v31 = vpop.f32.mrb[8].mxu0 }
 0xc29   : > { %v1602_v33 = vadd.f32 %v3054_v31, %v3925_v58  ;;  %v1582_v34 = vpop.f32.mrb[9].mxu0 }
 0xc2a   : > { %v1601_v35 = vadd.f32 %v1582_v34, %v3927_v59 }
 0xc2b   : > { %v4026_v37 = vadd.f32 %v1611_v29, %v1602_v33 }
 0xc2c   : > { %v4028_v38 = vadd.f32 %v1607_v28, %v1601_v35  ;;  %v3057_v39 = vpop.f32.mrb[10].mxu0 }
 0xc2d   : > { %v1604_v42 = vadd.f32 %v3057_v39, %v3933_v17  ;;  %v1592_v43 = vpop.f32.mrb[11].mxu0  ;;  %v2818_v17 = vld [vmem:[%s4271_s4 + $0x28] sm:$0xff] }
 0xc2e   : > { %v1603_v45 = vadd.f32 %v1592_v43, %v3935_v7  ;;  %v3211_v47 = vpack.c.bf16 %v4026_v37, %v4028_v38  ;;  %v3623_v7 = vmov 20  }
 0xc2f   : > { %v4034_v58 = vadd.f32 %v1619_v44, %v1604_v42  ;;  %3471 = vset.pattern.permute.xlu1 %v3623_v7  ;;  %3470 = vset.pattern.permute.xlu0 %v3623_v7  ;;  %v1903_v7 = vrot.slane %v3983_v46, 6 }
 0xc30   : > { %v4036_v48 = vadd.f32 %v1615_v30, %v1603_v45  ;;  %3212 = vmatprep.subr.bf16.mxu0 %v3211_v47 }
 0xc31   : > { %3214 = vmatpush3.bf16.msra.mxu0 %v3211_v47 }
 0xc32   : > { %v3215_v59 = vpack.c.bf16 %v4034_v58, %v4036_v48 }
 0xc34   : > { %3216 = vmatprep.subr.bf16.mxu0 %v3215_v59 }
 0xc35   : > { %3218 = vmatpush3.bf16.msra.mxu0 %v3215_v59 }
 0xc38   : > { %3067 = vmatmul.mubr.msk.f32.vlgmr.msra.gmra.mrb[12].mxu0 %vm705_vm2, %v2818_v17  ;;  %v2821_v17 = vld [vmem:[%s4273_s6 + $0x20] sm:$0xff] }
 0xc39   : > { %3081 = vmatprep.mubr.msk.f32.mxu1 %vm890_vm5, %v2821_v17 }
 0xd0b   : > { %v3068_v52 = vpop.f32.mrb[12].mxu0 }
 0xd0c   : > { %v1714_v53 = vadd.f32 %v3068_v52, %v1634_v51  ;;  %v1708_v54 = vpop.f32.mrb[13].mxu0 }
 0xd0d   : > { %v1709_v56 = vadd.f32 %v1708_v54, %v1630_v3  ;;  %v3625_v3 = vmov 22  }
 0xd0e   : > { %v1728_v57 = vadd.f32 %v1725_v55, %v1714_v53 }
 0xd0f   : > { %v1727_v14 = vadd.f32 %v1720_v50, %v1709_v56 }
 0xd10   : > { %v1738_v60 = vmul.f32 %v1735_v6, %v1728_v57  ;;  %vm1730_vm8 = vcmp.ge.f32.partialorder %v1728_v57, 0.0 }
 0xd11   : > { %v1737_v61 = vmul.f32 %v1735_v6, %v1727_v14  ;;  %vm1729_vm10 = vcmp.ge.f32.partialorder %v1727_v14, 0.0 }
 0xd12   : > { %v1740_v62 = vsel %vm1730_vm8, %v1728_v57, %v1738_v60  ;;  %v3626_v60 = vmov 23  }
 0xd13   : > { %v1739_v2 = vsel %vm1729_vm10, %v1727_v14, %v1737_v61  ;;  %v1753_v8 = vmul.f32 %v1740_v62, %v1740_v62  ;;  %v2822_v14 = vld [vmem:[%s4273_s6 + $0x28] sm:$0xff] }
 0xd14   : > { %v1741_v9 = vadd.f32 %v1740_v62, %v1739_v2  ;;  %v1752_v63 = vmul.f32 %v1739_v2, %v1739_v2 }
 0xd16   : > { %1742 = vadd.xlane.f32.xlu0 %v1741_v9  ;;  %v1754_v1 = vadd.f32 %v1753_v8, %v1752_v63 }
 0xd18   : > { %1755 = vadd.xlane.f32.xlu1 %v1754_v1 }
 0xd29   : > { %1782 = vperm.xlu1 %3471, %v3992_v49  }
 0xd2c   : > { %1778 = vperm.xlu0 %3470, %v3983_v46  }
 0xd2d   : > { %3472 = vset.pattern.permute.xlu1 %v3624_v4 }
 0xd2e   : > { %1788 = vperm.xlu1 %3472, %v3983_v46  }
 0xd30   : > { %3484 = vset.pattern.permute.xlu0 %v3625_v3 }
 0xd31   : > { %1817 = vperm.xlu0 %3484, %v3992_v49  }
 0xd32   : > { %1792 = vperm.xlu1 %3472, %v3992_v49  }
 0xd35   : > { %3486 = vset.pattern.permute.xlu0 %v3626_v60 }
 0xd36   : > { %3483 = vset.pattern.permute.xlu1 %v3625_v3 }
 0xda3   : > { %v1743_v5 = vpop.xlane.xlu0 %1742 }
 0xda4   : > { %v1744_v19 = vrot.slane %v1743_v5, 4 }
 0xda5   : > { %v1756_v23 = vpop.xlane.xlu1 %1755 }
 0xda6   : > { %v1745_v25 = vadd.f32 %v1744_v19, %v1743_v5  ;;  %v1757_v10 = vrot.slane %v1756_v23, 4 }
 0xda8   : > { %v1746_v11 = vrot.slane %v1745_v25, 2  ;;  %v1758_v12 = vadd.f32 %v1757_v10, %v1756_v23 }
 0xda9   : > { %v1783_v27 = vpop.permute.xlu1 %1782 }
 0xdaa   : > { %v1759_v13 = vrot.slane %v1758_v12, 2  ;;  %v1747_v16 = vadd.f32 %v1746_v11, %v1745_v25  ;;  %v3627_v11 = vmov 24  }
 0xdab   : > { %v1779_v34 = vpop.permute.xlu0 %1778 }
 0xdac   : > { %v1748_v18 = vrot.slane %v1747_v16, 1  ;;  %v1760_v20 = vadd.f32 %v1759_v13, %v1758_v12 }
 0xdad   : > { %v1789_v29 = vpop.permute.xlu1 %1788 }
 0xdae   : > { %v1749_v21 = vadd.f32 %v1748_v18, %v1747_v16  ;;  %v1761_v22 = vrot.slane %v1760_v20, 1 }
 0xdb0   : > { %3309 = vpush %v1749_v21  ;;  %v1762_v24 = vadd.f32 %v1761_v22, %v1760_v20  ;;  %v1818_v36 = vpop.permute.xlu0 %1817 }
 0xdb1   : > { %v1793_v43 = vpop.permute.xlu1 %1792 }
 0xdb2   : > { %3311 = vpush %v1762_v24 }
 0xde1   : > { %s3310_s21 = spop %3309 }
 0xde2   : > { %s1751_s11 = smul.f32 0.00048828125, %s3310_s21 }
 0xde3   : > { %s3312_s26 = spop %3311 }
 0xde4   : > { %s1765_s20 = smul.f32 %s1751_s11, %s1751_s11  ;;  %v1767_v28 = vstv %s1751_s11  ;;  %s4298_s11 = smov 127  }
 0xde5   : > { %s1764_s18 = smul.f32 0.00048828125, %s3312_s26  ;;  %v1768_v30 = vsub.f32 %v1739_v2, %v1767_v28  ;;  %v1769_v31 = vsub.f32 %v1740_v62, %v1767_v28 }
 0xde7   : > { %s1766_s30 = ssub.f32 %s1764_s18, %s1765_s20 }
 0xde9   : > { %s1770_s29 = sadd.f32 1e-05, %s1766_s30 }
 0xdeb   : > { %v1771_v32 = vstv %s1770_s29 }
 0xdec   : > { %3522 = vrsqrt.f32 %v1771_v32 }
 0xdf6   : > { %v3523_v26 = vpop.eup %3522 }
 0xdf7   : > { %3313 = vpush %v3523_v26 }
 0xe28   : > { %s3314_s25 = spop %3313 }
 0xe29   : > { %v1774_v33 = vstv %s3314_s25 }
 0xe2a   : > { %v1775_v35 = vmul.f32 %v1774_v33, %v1768_v30  ;;  %v1776_v39 = vmul.f32 %v1774_v33, %v1769_v31  ;;  %v2829_v31 = vld [vmem:[%s4274_s7 + $0x40] sm:$0xff]  ;;  %v3628_v33 = vmov 25  }
 0xe2b   : > { %3088 = vmatprep.mubr.msk.f32.mxu0 %vm411_vm0, %v2829_v31 }
 0xe2c   : > { %v1786_v40 = vmul.f32 %v1783_v27, %v1776_v39  ;;  %v1785_v42 = vmul.f32 %v1779_v34, %v1775_v35  ;;  %v4083_v34 = vld [vmem:[%s4276_s9 + $0x10] sm:$0xff]  ;;  %v4089_v35 = vld [vmem:[%s4276_s9 + $0x18] sm:$0xff] }
 0xe2e   : > { %v1796_v44 = vadd.f32 %v1793_v43, %v1786_v40  ;;  %v1795_v45 = vadd.f32 %v1789_v29, %v1785_v42 }
 0xe30   : > { %v3473_v47 = vpack.i.bf16 %v1796_v44, %v1795_v45  ;;  %v3225_v59 = vpack.c.bf16 %v1796_v44, %v1795_v45 }
 0xe32   : > { %3474 = vrot.lane.b32.xlu1 %v3473_v47, %s4297_s12 }
 0xe36   : > { %3479 = vrot.lane.b32.xlu1 %v3473_v47, %s4298_s11 }
 0xe3a   : > { %1904 = vrot.lane.b32.xlu1 %v1903_v7, %s4283_s28 }
 0xe3e   : > { %1813 = vperm.xlu1 %3483, %v3983_v46  }
 0xe42   : > { %3485 = vset.pattern.permute.xlu1 %v3626_v60  ;;  %v2189_v60 = vrot.slane %v3983_v46, 3 }
 0xea4   : > { %v3475_v50 = vpop.permute.xlu1 %3474 }
 0xea5   : > { %v3477_v51 = vunpack.i.h.bf16 %v3475_v50  ;;  %v3476_v52 = vunpack.i.l.bf16 %v3475_v50 }
 0xea7   : > { %v3219_v53 = vpack.c.bf16 %v3477_v51, %v3476_v52 }
 0xea8   : > { %v3480_v54 = vpop.permute.xlu1 %3479 }
 0xea9   : > { %v3482_v55 = vunpack.i.h.bf16 %v3480_v54  ;;  %v3481_v56 = vunpack.i.l.bf16 %v3480_v54  ;;  %3221 = vmatprep.subr.msk.bf16.mxu1 %vm3870_vm7, %v3219_v53 }
 0xeaa   : > { %3224 = vmatpush3.bf16.msk.msra.mxu1 %vm3870_vm7, %v3219_v53 }
 0xeab   : > { %3226 = vmatprep.subr.bf16.mxu1 %v3225_v59  ;;  %v3229_v57 = vpack.c.bf16 %v3482_v55, %v3481_v56  ;;  %v2830_v56 = vld [vmem:[%s4274_s7 + $0x48] sm:$0xff] }
 0xeac   : > { %v1905_v6 = vpop.permute.xlu1 %1904 }
 0xead   : > { %3315 = vpush %v1905_v6  ;;  %v2831_v6 = vld [vmem:[%s4274_s7 + $0x50] sm:$0xff] }
 0xeae   : > { %3228 = vmatpush3.bf16.msra.mxu1 %v3225_v59 }
 0xeaf   : > { %3231 = vmatprep.subr.msk.bf16.mxu1 %vm3879_vm9, %v3229_v57 }
 0xeb2   : > { %3234 = vmatpush3.bf16.msk.msra.mxu1 %vm3879_vm9, %v3229_v57  ;;  %v2832_v57 = vld [vmem:[%s4274_s7 + $0x58] sm:$0xff] }
 0xeb5   : > { %3082 = vmatmul.mubr.msk.f32.vlgmr.msra.gmra.mrb[12].mxu1 %vm890_vm5, %v2822_v14  ;;  %v2837_v14 = vld [vmem:[%s4271_s4 + $0x30] sm:$0xff] }
 0xebd   : > { %v1814_v61 = vpop.permute.xlu1 %1813 }
 0xede   : > { %s3316_s30 = spop %3315 }
 0xedf   : > { %v1907_v2 = vstv %s3316_s30 }
 0xf88   : > { %v3083_v62 = vpop.f32.mrb[12].mxu1 }
 0xf89   : > { %v1898_v8 = vadd.f32 %v3083_v62, %v1818_v36  ;;  %v1892_v9 = vpop.f32.mrb[13].mxu1  ;;  %v3629_v36 = vmov 26  }
 0xf8a   : > { %v1893_v63 = vadd.f32 %v1892_v9, %v1814_v61 }
 0xf8b   : > { %vm1902_vm7 = vcmp.ge.f32.partialorder %v1898_v8, 0.0  ;;  %v1910_v41 = vmul.f32 %v1907_v2, %v1898_v8 }
 0xf8c   : > { %vm1901_vm9 = vcmp.ge.f32.partialorder %v1893_v63, 0.0  ;;  %v1909_v1 = vmul.f32 %v1907_v2, %v1893_v63 }
 0xf8d   : > { %v1912_v4 = vsel %vm1902_vm7, %v1898_v8, %v1910_v41 }
 0xf8e   : > { %v1911_v5 = vsel %vm1901_vm9, %v1893_v63, %v1909_v1  ;;  %v1925_v19 = vmul.f32 %v1912_v4, %v1912_v4 }
 0xf8f   : > { %v1913_v23 = vadd.f32 %v1912_v4, %v1911_v5  ;;  %v1924_v25 = vmul.f32 %v1911_v5, %v1911_v5 }
 0xf91   : > { %1914 = vadd.xlane.f32.xlu1 %v1913_v23  ;;  %v1926_v10 = vadd.f32 %v1925_v19, %v1924_v25 }
 0xf93   : > { %1927 = vadd.xlane.f32.xlu0 %v1926_v10 }
 0xfa2   : > { %1950 = vperm.xlu1 %3485, %v3983_v46  }
 0xfa6   : > { %3487 = vset.pattern.permute.xlu1 %v3627_v11 }
 0xfa7   : > { %1960 = vperm.xlu1 %3487, %v3983_v46  }
 0xfa9   : > { %1954 = vperm.xlu0 %3486, %v3992_v49  }
 0xfab   : > { %1964 = vperm.xlu1 %3487, %v3992_v49  }
 0xfad   : > { %3489 = vset.pattern.permute.xlu0 %v3629_v36 }
 0xfae   : > { %2099 = vperm.xlu0 %3489, %v3983_v46  }
 0xfaf   : > { %3488 = vset.pattern.permute.xlu1 %v3628_v33 }
 0xfb0   : > { %2076 = vperm.xlu1 %3488, %v3983_v46  }
 0xfb4   : > { %2080 = vperm.xlu1 %3488, %v3992_v49  }
 0xfb8   : > { %2084 = vperm.xlu1 %3488, %v4083_v34  }
 0xfbc   : > { %2088 = vperm.xlu1 %3488, %v4089_v35  }
 0xfc0   : > { %3490 = vset.pattern.permute.xlu1 %v3629_v36 }
0x101e   : > { %v1915_v12 = vpop.xlane.xlu1 %1914 }
0x101f   : > { %v1916_v13 = vrot.slane %v1915_v12, 4 }
0x1020   : > { %v1928_v16 = vpop.xlane.xlu0 %1927 }
0x1021   : > { %v1917_v18 = vadd.f32 %v1916_v13, %v1915_v12  ;;  %v1929_v20 = vrot.slane %v1928_v16, 4 }
0x1022   : > { %v1951_v42 = vpop.permute.xlu1 %1950 }
0x1023   : > { %v1918_v21 = vrot.slane %v1917_v18, 2  ;;  %v1930_v22 = vadd.f32 %v1929_v20, %v1928_v16 }
0x1025   : > { %v1931_v24 = vrot.slane %v1930_v22, 2  ;;  %v1919_v32 = vadd.f32 %v1918_v21, %v1917_v18 }
0x1026   : > { %v1961_v44 = vpop.permute.xlu1 %1960 }
0x1027   : > { %v1920_v26 = vrot.slane %v1919_v32, 1  ;;  %v1932_v27 = vadd.f32 %v1931_v24, %v1930_v22 }
0x1028   : > { %v1955_v17 = vpop.permute.xlu0 %1954 }
0x1029   : > { %v1921_v28 = vadd.f32 %v1920_v26, %v1919_v32  ;;  %v1933_v29 = vrot.slane %v1932_v27, 1 }
0x102a   : > { %v1965_v52 = vpop.permute.xlu1 %1964 }
0x102b   : > { %3317 = vpush %v1921_v28  ;;  %v1934_v30 = vadd.f32 %v1933_v29, %v1932_v27 }
0x102d   : > { %3319 = vpush %v1934_v30  ;;  %v2100_v18 = vpop.permute.xlu0 %2099 }
0x102f   : > { %v2077_v61 = vpop.permute.xlu1 %2076 }
0x1033   : > { %v2081_v62 = vpop.permute.xlu1 %2080 }
0x1037   : > { %v2085_v2 = vpop.permute.xlu1 %2084 }
0x103b   : > { %v2089_v8 = vpop.permute.xlu1 %2088 }
0x105c   : > { %s3318_s20 = spop %3317 }
0x105d   : > { %s1923_s18 = smul.f32 0.00048828125, %s3318_s20 }
0x105e   : > { %s3320_s30 = spop %3319 }
0x105f   : > { %s1937_s29 = smul.f32 %s1923_s18, %s1923_s18  ;;  %v1939_v43 = vstv %s1923_s18 }
0x1060   : > { %s1936_s25 = smul.f32 0.00048828125, %s3320_s30  ;;  %v1940_v45 = vsub.f32 %v1911_v5, %v1939_v43  ;;  %v1941_v47 = vsub.f32 %v1912_v4, %v1939_v43 }
0x1062   : > { %s1938_s28 = ssub.f32 %s1936_s25, %s1937_s29  ;;  %s4299_s29 = smov 124  }
0x1063   : > { %2190 = vrot.lane.b32.xlu1 %v2189_v60, %s4299_s29 }
0x1064   : > { %s1942_s0 = sadd.f32 1e-05, %s1938_s28 }
0x1066   : > { %v1943_v39 = vstv %s1942_s0 }
0x1067   : > { %3524 = vrsqrt.f32 %v1943_v39  ;;  %2103 = vperm.xlu1 %3490, %v3992_v49  }
0x1071   : > { %v3525_v40 = vpop.eup %3524 }
0x1072   : > { %3321 = vpush %v3525_v40  ;;  %v3631_v40 = vmov 28  }
0x10a3   : > { %s3322_s12 = spop %3321 }
0x10a4   : > { %v1946_v59 = vstv %s3322_s12  ;;  %s4300_s12 = smov 2  }
0x10a5   : > { %v1947_v7 = vmul.f32 %v1946_v59, %v1940_v45  ;;  %v1948_v3 = vmul.f32 %v1946_v59, %v1941_v47 }
0x10a7   : > { %v1957_v50 = vmul.f32 %v1951_v42, %v1947_v7  ;;  %v1958_v51 = vmul.f32 %v1955_v17, %v1948_v3 }
0x10a9   : > { %v1967_v53 = vadd.f32 %v1961_v44, %v1957_v50  ;;  %v1968_v54 = vadd.f32 %v1965_v52, %v1958_v51 }
0x10ab   : > { %v3235_v55 = vpack.c.bf16 %v1968_v54, %v1967_v53 }
0x10ad   : > { %3236 = vmatprep.subr.bf16.mxu0 %v3235_v55 }
0x10ae   : > { %3238 = vmatpush3.bf16.msra.mxu0 %v3235_v55 }
0x10b1   : > { %3089 = vmatmul.mubr.msk.f32.vlgmr.msra.gmra.mrb[14].mxu0 %vm411_vm0, %v2830_v56 }
0x10b2   : > { %3091 = vmatprep.mubr.msk.f32.mxu0 %vm411_vm0, %v2831_v6 }
0x10b5   : > { %3092 = vmatmul.mubr.msk.f32.gmra.mrb[16].mxu0 %vm411_vm0, %v2832_v57 }
0x10b6   : > { %3102 = vmatprep.mubr.msk.f32.mxu0 %vm705_vm2, %v2837_v14 }
0x10d5   : > { %v2191_v23 = vpop.permute.xlu1 %2190 }
0x10d6   : > { %3323 = vpush %v2191_v23 }
0x10e6   : > { %v2104_v16 = vpop.permute.xlu1 %2103 }
0x1107   : > { %s3324_s0 = spop %3323 }
0x1108   : > { %v2193_v21 = vstv %s3324_s0 }
0x1184   : > { %v3090_v9 = vpop.f32.mrb[14].mxu0 }
0x1185   : > { %v2072_v63 = vadd.f32 %v3090_v9, %v4026_v37  ;;  %v2052_v41 = vpop.f32.mrb[15].mxu0 }
0x1186   : > { %v2071_v1 = vadd.f32 %v2052_v41, %v4028_v38 }
0x1187   : > { %v4114_v4 = vadd.f32 %v2081_v62, %v2072_v63 }
0x1188   : > { %v4116_v5 = vadd.f32 %v2077_v61, %v2071_v1  ;;  %v3093_v19 = vpop.f32.mrb[16].mxu0 }
0x1189   : > { %v2074_v25 = vadd.f32 %v3093_v19, %v4034_v58  ;;  %v2062_v10 = vpop.f32.mrb[17].mxu0  ;;  %v2838_v58 = vld [vmem:[%s4271_s4 + $0x38] sm:$0xff] }
0x118a   : > { %v2073_v11 = vadd.f32 %v2062_v10, %v4036_v48  ;;  %v3239_v12 = vpack.c.bf16 %v4114_v4, %v4116_v5  ;;  %v3630_v48 = vmov 27   ;;  %v2841_v10 = vld [vmem:[%s4273_s6 + $0x30] sm:$0xff] }
0x118b   : > { %v4122_v13 = vadd.f32 %v2089_v8, %v2074_v25  ;;  %3492 = vset.pattern.permute.xlu1 %v3630_v48  ;;  %3491 = vset.pattern.permute.xlu0 %v3630_v48 }
0x118c   : > { %v4124_v37 = vadd.f32 %v2085_v2, %v2073_v11  ;;  %3240 = vmatprep.subr.bf16.mxu0 %v3239_v12  ;;  %3117 = vmatprep.mubr.msk.f32.mxu1 %vm890_vm5, %v2841_v10  ;;  %v2361_v11 = vrot.slane %v3983_v46, 7 }
0x118d   : > { %3242 = vmatpush3.bf16.msra.mxu0 %v3239_v12  ;;  %v3632_v12 = vmov 29  }
0x118e   : > { %v3243_v38 = vpack.c.bf16 %v4122_v13, %v4124_v37 }
0x1190   : > { %3244 = vmatprep.subr.bf16.mxu0 %v3243_v38 }
0x1191   : > { %3246 = vmatpush3.bf16.msra.mxu0 %v3243_v38 }
0x1194   : > { %3103 = vmatmul.mubr.msk.f32.vlgmr.msra.gmra.mrb[18].mxu0 %vm705_vm2, %v2838_v58 }
0x1267   : > { %v3104_v20 = vpop.f32.mrb[18].mxu0 }
0x1268   : > { %v2184_v22 = vadd.f32 %v3104_v20, %v2104_v16  ;;  %v2178_v24 = vpop.f32.mrb[19].mxu0 }
0x1269   : > { %v2179_v32 = vadd.f32 %v2178_v24, %v2100_v18 }
0x126a   : > { %vm2188_vm11 = vcmp.ge.f32.partialorder %v2184_v22, 0.0  ;;  %v2196_v26 = vmul.f32 %v2193_v21, %v2184_v22 }
0x126b   : > { %vm2187_vm12 = vcmp.ge.f32.partialorder %v2179_v32, 0.0  ;;  %v2195_v27 = vmul.f32 %v2193_v21, %v2179_v32 }
0x126c   : > { %v2198_v28 = vsel %vm2188_vm11, %v2184_v22, %v2196_v26  ;;  %v3633_v26 = vmov 30  }
0x126d   : > { %v2197_v29 = vsel %vm2187_vm12, %v2179_v32, %v2195_v27  ;;  %v2211_v30 = vmul.f32 %v2198_v28, %v2198_v28  ;;  %v2842_v32 = vld [vmem:[%s4273_s6 + $0x38] sm:$0xff] }
0x126e   : > { %v2199_v31 = vadd.f32 %v2198_v28, %v2197_v29  ;;  %v2210_v33 = vmul.f32 %v2197_v29, %v2197_v29 }
0x1270   : > { %2200 = vadd.xlane.f32.xlu1 %v2199_v31  ;;  %v2212_v39 = vadd.f32 %v2211_v30, %v2210_v33 }
0x1272   : > { %2213 = vadd.xlane.f32.xlu0 %v2212_v39 }
0x1281   : > { %2240 = vperm.xlu1 %3492, %v3992_v49  }
0x1285   : > { %3493 = vset.pattern.permute.xlu1 %v3631_v40 }
0x1286   : > { %2246 = vperm.xlu1 %3493, %v3983_v46  }
0x1288   : > { %2236 = vperm.xlu0 %3491, %v3983_v46  }
0x128a   : > { %2250 = vperm.xlu1 %3493, %v3992_v49  }
0x128c   : > { %3505 = vset.pattern.permute.xlu0 %v3633_v26 }
0x128e   : > { %3504 = vset.pattern.permute.xlu1 %v3632_v12 }
0x12fd   : > { %v2201_v42 = vpop.xlane.xlu1 %2200 }
0x12fe   : > { %v2202_v43 = vrot.slane %v2201_v42, 4 }
0x12ff   : > { %v2214_v44 = vpop.xlane.xlu0 %2213 }
0x1300   : > { %v2203_v45 = vadd.f32 %v2202_v43, %v2201_v42  ;;  %v2215_v47 = vrot.slane %v2214_v44, 4 }
0x1301   : > { %v2241_v6 = vpop.permute.xlu1 %2240 }
0x1302   : > { %v2204_v59 = vrot.slane %v2203_v45, 2  ;;  %v2216_v17 = vadd.f32 %v2215_v47, %v2214_v44 }
0x1304   : > { %v2217_v7 = vrot.slane %v2216_v17, 2  ;;  %v2205_v3 = vadd.f32 %v2204_v59, %v2203_v45  ;;  %v3634_v59 = vmov 31  }
0x1305   : > { %v2247_v14 = vpop.permute.xlu1 %2246 }
0x1306   : > { %v2206_v50 = vrot.slane %v2205_v3, 1  ;;  %v2218_v51 = vadd.f32 %v2217_v7, %v2216_v17 }
0x1307   : > { %v2237_v62 = vpop.permute.xlu0 %2236 }
0x1308   : > { %v2207_v52 = vadd.f32 %v2206_v50, %v2205_v3  ;;  %v2219_v53 = vrot.slane %v2218_v51, 1 }
0x1309   : > { %v2251_v41 = vpop.permute.xlu1 %2250 }
0x130a   : > { %3325 = vpush %v2207_v52  ;;  %v2220_v54 = vadd.f32 %v2219_v53, %v2218_v51 }
0x130c   : > { %3327 = vpush %v2220_v54 }
0x133b   : > { %s3326_s28 = spop %3325 }
0x133c   : > { %s2209_s21 = smul.f32 0.00048828125, %s3326_s28 }
0x133d   : > { %s3328_s26 = spop %3327 }
0x133e   : > { %s2223_s11 = smul.f32 %s2209_s21, %s2209_s21  ;;  %v2225_v57 = vstv %s2209_s21  ;;  %s4301_s21 = smov 126  }
0x133f   : > { %s2222_s20 = smul.f32 0.00048828125, %s3328_s26  ;;  %v2226_v60 = vsub.f32 %v2197_v29, %v2225_v57  ;;  %v2227_v36 = vsub.f32 %v2198_v28, %v2225_v57 }
0x1341   : > { %s2224_s18 = ssub.f32 %s2222_s20, %s2223_s11 }
0x1343   : > { %s2228_s30 = sadd.f32 1e-05, %s2224_s18 }
0x1345   : > { %v2229_v55 = vstv %s2228_s30 }
0x1346   : > { %3526 = vrsqrt.f32 %v2229_v55 }
0x1350   : > { %v3527_v56 = vpop.eup %3526 }
0x1351   : > { %3329 = vpush %v3527_v56 }
0x1382   : > { %s3330_s25 = spop %3329 }
0x1383   : > { %v2232_v61 = vstv %s3330_s25 }
0x1384   : > { %v2233_v2 = vmul.f32 %v2232_v61, %v2226_v60  ;;  %v2234_v8 = vmul.f32 %v2232_v61, %v2227_v36  ;;  %v2849_v36 = vld [vmem:[%s4274_s7 + $0x60] sm:$0xff]  ;;  %v3635_v61 = vmov 32  }
0x1385   : > { %3124 = vmatprep.mubr.msk.f32.mxu0 %vm411_vm0, %v2849_v36 }
0x1386   : > { %v2243_v9 = vmul.f32 %v2237_v62, %v2233_v2  ;;  %v2244_v63 = vmul.f32 %v2241_v6, %v2234_v8 }
0x1388   : > { %v2253_v1 = vadd.f32 %v2247_v14, %v2243_v9  ;;  %v2254_v19 = vadd.f32 %v2251_v41, %v2244_v63 }
0x138a   : > { %v3494_v23 = vpack.i.bf16 %v2254_v19, %v2253_v1  ;;  %v3253_v25 = vpack.c.bf16 %v2254_v19, %v2253_v1 }
0x138c   : > { %3495 = vrot.lane.b32.xlu1 %v3494_v23, %s4300_s12 }
0x1390   : > { %3500 = vrot.lane.b32.xlu1 %v3494_v23, %s4301_s21 }
0x1394   : > { %2362 = vrot.lane.b32.xlu1 %v2361_v11, %s4299_s29 }
0x1398   : > { %2271 = vperm.xlu1 %3504, %v3983_v46  }
0x139c   : > { %2275 = vperm.xlu1 %3504, %v3992_v49  }
0x13a0   : > { %3506 = vset.pattern.permute.xlu1 %v3633_v26 }
0x13fe   : > { %v3496_v38 = vpop.permute.xlu1 %3495 }
0x13ff   : > { %v3498_v58 = vunpack.i.h.bf16 %v3496_v38  ;;  %v3497_v48 = vunpack.i.l.bf16 %v3496_v38 }
0x1401   : > { %v3247_v16 = vpack.c.bf16 %v3498_v58, %v3497_v48  ;;  %v2850_v58 = vld [vmem:[%s4274_s7 + $0x68] sm:$0xff]  ;;  %v2851_v48 = vld [vmem:[%s4274_s7 + $0x70] sm:$0xff] }
0x1402   : > { %v3501_v18 = vpop.permute.xlu1 %3500 }
0x1403   : > { %v3503_v20 = vunpack.i.h.bf16 %v3501_v18  ;;  %v3502_v21 = vunpack.i.l.bf16 %v3501_v18  ;;  %3249 = vmatprep.subr.msk.bf16.mxu1 %vm3958_vm15, %v3247_v16  ;;  %v3636_v18 = vmov 0.0|0.0  }
0x1404   : > { %3252 = vmatpush3.bf16.msk.msra.mxu1 %vm3958_vm15, %v3247_v16  ;;  %v2852_v16 = vld [vmem:[%s4274_s7 + $0x78] sm:$0xff] }
0x1405   : > { %3254 = vmatprep.subr.bf16.mxu1 %v3253_v25  ;;  %v3257_v24 = vpack.c.bf16 %v3503_v20, %v3502_v21  ;;  %v3638_v20 = vmov 0.0   ;;  %v3639_v21 = vmov 3  }
0x1406   : > { %v2363_v22 = vpop.permute.xlu1 %2362 }
0x1407   : > { %3331 = vpush %v2363_v22  ;;  %v3534_v22 = vld [vmem:[%s4276_s9] sm:$0xff] }
0x1408   : > { %3256 = vmatpush3.bf16.msra.mxu1 %v3253_v25 }
0x1409   : > { %3259 = vmatprep.subr.msk.bf16.mxu1 %vm3967_vm3, %v3257_v24 }
0x140c   : > { %3262 = vmatpush3.bf16.msk.msra.mxu1 %vm3967_vm3, %v3257_v24  ;;  %v3535_v24 = vld [vmem:[%s4276_s9 + $0x8] sm:$0xff] }
0x140f   : > { %3118 = vmatmul.mubr.msk.f32.vlgmr.msra.gmra.mrb[14].mxu1 %vm890_vm5, %v2842_v32  ;;  %vm3637_vm5 = vmmov 0  }
0x1417   : > { %v2272_v15 = vpop.permute.xlu1 %2271 }
0x141b   : > { %v2276_v27 = vpop.permute.xlu1 %2275 }
0x1438   : > { %s3332_s11 = spop %3331 }
0x1439   : > { %v2365_v29 = vstv %s3332_s11  ;;  %s3339_s11 = smul.u32 384, %s3719_s17 }
0x14e2   : > { %v3119_v28 = vpop.f32.mrb[14].mxu1 }
0x14e3   : > { %v2356_v30 = vadd.f32 %v3119_v28, %v2276_v27  ;;  %v2350_v31 = vpop.f32.mrb[15].mxu1 }
0x14e4   : > { %v2351_v33 = vadd.f32 %v2350_v31, %v2272_v15 }
0x14e5   : > { %vm2360_vm13 = vcmp.ge.f32.partialorder %v2356_v30, 0.0  ;;  %v2368_v0 = vmul.f32 %v2365_v29, %v2356_v30 }
0x14e6   : > { %vm2359_vm14 = vcmp.ge.f32.partialorder %v2351_v33, 0.0  ;;  %v2367_v39 = vmul.f32 %v2365_v29, %v2351_v33 }
0x14e7   : > { %v2370_v40 = vsel %vm2360_vm13, %v2356_v30, %v2368_v0 }
0x14e8   : > { %v2369_v42 = vsel %vm2359_vm14, %v2351_v33, %v2367_v39  ;;  %v2383_v43 = vmul.f32 %v2370_v40, %v2370_v40 }
0x14e9   : > { %v2371_v44 = vadd.f32 %v2370_v40, %v2369_v42  ;;  %v2382_v45 = vmul.f32 %v2369_v42, %v2369_v42 }
0x14eb   : > { %2372 = vadd.xlane.f32.xlu0 %v2371_v44  ;;  %v2384_v47 = vadd.f32 %v2383_v43, %v2382_v45 }
0x14ed   : > { %2385 = vadd.xlane.f32.xlu1 %v2384_v47 }
0x14fe   : > { %2412 = vperm.xlu1 %3506, %v3992_v49  }
0x1501   : > { %2408 = vperm.xlu0 %3505, %v3983_v46  }
0x1502   : > { %3507 = vset.pattern.permute.xlu1 %v3634_v59 }
0x1503   : > { %2418 = vperm.xlu1 %3507, %v3983_v46  }
0x1505   : > { %3509 = vset.pattern.permute.xlu0 %v3635_v61 }
0x1506   : > { %2546 = vperm.xlu0 %3509, %v4089_v35  }
0x1507   : > { %2422 = vperm.xlu1 %3507, %v3992_v49  }
0x150a   : > { %3511 = vset.pattern.permute.xlu0 %v3639_v21 }
0x150b   : > { %3508 = vset.pattern.permute.xlu1 %v3635_v61  ;;  %2565 = vperm.xlu0 %3511, %v4083_v34  }
0x150c   : > { %2534 = vperm.xlu1 %3508, %v3983_v46  }
0x1510   : > { %2538 = vperm.xlu1 %3508, %v3992_v49  }
0x1514   : > { %2542 = vperm.xlu1 %3508, %v4083_v34  }
0x1518   : > { %3510 = vset.pattern.permute.xlu1 %v3639_v21 }
0x1519   : > { %2557 = vperm.xlu1 %3510, %v3534_v22  }
0x151d   : > { %2561 = vperm.xlu1 %3510, %v3535_v24  }
0x1578   : > { %v2373_v17 = vpop.xlane.xlu0 %2372 }
0x1579   : > { %v2374_v7 = vrot.slane %v2373_v17, 4 }
0x157a   : > { %v2386_v3 = vpop.xlane.xlu1 %2385 }
0x157b   : > { %v2375_v50 = vadd.f32 %v2374_v7, %v2373_v17  ;;  %v2387_v51 = vrot.slane %v2386_v3, 4 }
0x157d   : > { %v2376_v52 = vrot.slane %v2375_v50, 2  ;;  %v2388_v53 = vadd.f32 %v2387_v51, %v2386_v3 }
0x157e   : > { %v2413_v8 = vpop.permute.xlu1 %2412 }
0x157f   : > { %v2389_v54 = vrot.slane %v2388_v53, 2  ;;  %v2377_v55 = vadd.f32 %v2376_v52, %v2375_v50 }
0x1580   : > { %v2409_v41 = vpop.permute.xlu0 %2408 }
0x1581   : > { %v2378_v56 = vrot.slane %v2377_v55, 1  ;;  %v2390_v6 = vadd.f32 %v2389_v54, %v2388_v53 }
0x1582   : > { %v2419_v46 = vpop.permute.xlu1 %2418 }
0x1583   : > { %v2379_v57 = vadd.f32 %v2378_v56, %v2377_v55  ;;  %v2391_v14 = vrot.slane %v2390_v6, 1 }
0x1585   : > { %3333 = vpush %v2379_v57  ;;  %v2392_v60 = vadd.f32 %v2391_v14, %v2390_v6  ;;  %v2547_v0 = vpop.permute.xlu0 %2546 }
0x1586   : > { %v2423_v10 = vpop.permute.xlu1 %2422 }
0x1587   : > { %3335 = vpush %v2392_v60 }
0x158a   : > { %v2566_v6 = vpop.permute.xlu0 %2565 }
0x158b   : > { %v2535_v32 = vpop.permute.xlu1 %2534 }
0x158f   : > { %v2539_v15 = vpop.permute.xlu1 %2538 }
0x1593   : > { %v2543_v43 = vpop.permute.xlu1 %2542 }
0x1598   : > { %v2558_v47 = vpop.permute.xlu1 %2557 }
0x159c   : > { %v2562_v50 = vpop.permute.xlu1 %2561 }
0x15b6   : > { %s3334_s30 = spop %3333 }
0x15b7   : > { %s2381_s25 = smul.f32 0.00048828125, %s3334_s30 }
0x15b8   : > { %s3336_s12 = spop %3335 }
0x15b9   : > { %s2395_s0 = smul.f32 %s2381_s25, %s2381_s25  ;;  %v2397_v9 = vstv %s2381_s25  ;;  %s4222_s25 = scalar_lea.hbm %s4277_s10, %s3339_s11 }
0x15ba   : > { %s2394_s28 = smul.f32 0.00048828125, %s3336_s12  ;;  %v2398_v63 = vsub.f32 %v2369_v42, %v2397_v9  ;;  %v2399_v35 = vsub.f32 %v2370_v40, %v2397_v9  ;;  %s380_s12 = sand.u32 1, %s3590_s14  }
0x15bb   : > { %s4226_s17 = scalar_lea.sflag [#allocation3], %s380_s12 }
0x15bc   : > { %s2396_s21 = ssub.f32 %s2394_s28, %s2395_s0  ;;  %s4302_s0 = smul.u32 24, %s3756_s27 }
0x15bd   : > { %s3640_s28 = smov [#allocation2]  }
0x15be   : > { %s2400_s29 = sadd.f32 1e-05, %s2396_s21  ;;  %s3540_s21 = sshll.u32 %s3640_s28, 4  ;;  %s3541_s21 = int_to_ptr.vmem [resolvable:$false] %s3540_s21 }
0x15c0   : > { %v2401_v62 = vstv %s2400_s29  ;;  %s392_s29 = scalar_lea.vmem %s4268_s1, %s4302_s0 }
0x15c1   : > { %3528 = vrsqrt.f32 %v2401_v62  ;;  %v2660_v3 = vld [vmem:[%s392_s29] sm:$0xff]  ;;  %v2661_v56 = vld [vmem:[%s392_s29 + $0x8] sm:$0xff]  ;;  %v2662_v62 = vld [vmem:[%s392_s29 + $0x10] sm:$0xff]  ;;  %s3542_s29 = scalar_lea.vmem %s3541_s21, 768 }
0x15cb   : > { %v3529_v2 = vpop.eup %3528 }
0x15cc   : > { %3337 = vpush %v3529_v2 }
0x15fd   : > { %s3338_s26 = spop %3337 }
0x15fe   : > { %v2404_v49 = vstv %s3338_s26  ;;  %s3273_s26 = smul.u32 24, %s380_s12 }
0x15ff   : > { %v2405_v1 = vmul.f32 %v2404_v49, %v2398_v63  ;;  %v2406_v19 = vmul.f32 %v2404_v49, %v2399_v35 }
0x1600   : > { %s382_s27 = scalar_lea.vmem [#allocation2], %s3273_s26 }
0x1601   : > { %v2416_v23 = vmul.f32 %v2413_v8, %v2406_v19  ;;  %v2415_v25 = vmul.f32 %v2409_v41, %v2405_v1  ;;  %s2683_s20 = sshll.u32 %s382_s27, 4  ;;  %s4217_s20 = int_to_ptr.vmem [resolvable:$true] %s2683_s20 }
0x1602   : > { %s3536_s0 = scalar_lea.vmem %s4217_s20, 384  ;;  %p3543_p0 = scmp.lt.s32.totalorder %s4217_s20, %s3541_s21 }
0x1603   : > { %v2426_v11 = vadd.f32 %v2423_v10, %v2416_v23  ;;  %v2425_v12 = vadd.f32 %v2419_v46, %v2415_v25  ;;  %p3537_p11 = scmp.ne.s32.totalorder %s4217_s20, %s3536_s0  ;;  %p3544_p1 = scmp.lt.s32.totalorder %s3542_s29, %s3536_s0 }
0x1605   : > { %v3263_v38 = vpack.c.bf16 %v2426_v11, %v2425_v12  ;;  %p3538_p12 = pnand %p3537_p11, %p3736_p5  ;;  %p3545_p2 = por %p3544_p1, %p3543_p0 }
0x1607   : > { %3264 = vmatprep.subr.bf16.mxu0 %v3263_v38  ;;  %p3539_p13 = pneg %p3538_p12 }
0x1608   : > { %3266 = vmatpush3.bf16.msra.mxu0 %v3263_v38 }
0x1609   : > { %3267 = vmatprep.subr.bf16.mxu0 %v3636_v18  ;;  %p3546_p3 = pnand %p3545_p2, %p3539_p13 }
0x160b   : > { %3125 = vmatmul.mubr.msk.f32.vlgmr.msra.gmra.mrb[20].mxu0 %vm411_vm0, %v2850_v58 }
0x160c   : > { %3127 = vmatprep.mubr.msk.f32.mxu0 %vm411_vm0, %v2851_v48 }
0x160f   : > { %3128 = vmatmul.mubr.msk.f32.gmra.mrb[22].mxu0 %vm411_vm0, %v2852_v16 }
0x1610   : > { %3138 = vmatprep.mubr.msk.f32.mxu0 %vm3637_vm5, %v3638_v20 }
0x16de   : > { %v3126_v26 = vpop.f32.mrb[20].mxu0 }
0x16df   : > { %v2530_v27 = vadd.f32 %v3126_v26, %v4114_v4  ;;  %v2510_v28 = vpop.f32.mrb[21].mxu0 }
0x16e0   : > { %v2529_v29 = vadd.f32 %v2510_v28, %v4116_v5  ;;  %v2553_v5 = vld [vmem:[%s4275_s8] sm:$0xff] }
0x16e1   : > { %v2550_v30 = vadd.f32 %v2539_v15, %v2530_v27 }
0x16e2   : > { %v2549_v31 = vadd.f32 %v2535_v32, %v2529_v29  ;;  %v3129_v33 = vpop.f32.mrb[22].mxu0 }
0x16e3   : > { %v2532_v39 = vadd.f32 %v3129_v33, %v4122_v13  ;;  %v2520_v34 = vpop.f32.mrb[23].mxu0  ;;  %v2554_v13 = vld [vmem:[%s4275_s8 + $0x8] sm:$0xff] }
0x16e4   : > { %v3268_v40 = vpack.c.bf16 %v2550_v30, %v2549_v31  ;;  %v2531_v42 = vadd.f32 %v2520_v34, %v4124_v37  ;;  %v2555_v37 = vld [vmem:[%s4275_s8 + $0x10] sm:$0xff] }
0x16e5   : > { %v2552_v44 = vadd.f32 %v2547_v0, %v2532_v39 }
0x16e6   : > { %v2551_v45 = vadd.f32 %v2543_v43, %v2531_v42  ;;  %3269 = vmatpush3.bf16.msra.mxu0 %v3268_v40 }
0x16e7   : > { %3270 = vmatprep.subr.bf16.mxu0 %v3636_v18 }
0x16e8   : > { %v3271_v4 = vpack.c.bf16 %v2552_v44, %v2551_v45 }
0x16ea   : > { %3272 = vmatpush3.bf16.msra.mxu0 %v3271_v4 }
0x16ed   : > { %3139 = vmatmul.mubr.msk.f32.vlgmr.msra.gmra.mrb[24].mxu0 %vm705_vm2, %v2553_v5 }
0x16ee   : > { %3141 = vmatprep.mubr.msk.f32.mxu0 %vm3637_vm5, %v3638_v20 }
0x16f1   : > { %3142 = vmatmul.mubr.msk.f32.gmra.mrb[26].mxu0 %vm705_vm2, %v2554_v13 }
0x16f2   : > { %3144 = vmatprep.mubr.msk.f32.mxu0 %vm3637_vm5, %v3638_v20 }
0x16f5   : > { %3145 = vmatmul.mubr.msk.f32.gmra.mrb[28].mxu0 %vm705_vm2, %v2555_v37 }
0x17c0   : > { %v2643_v59 = vpop.f32.mrb[24].mxu0 }
0x17c1   : > { %v2644_v17 = vadd.f32 %v2643_v59, %v2558_v47  ;;  %v3140_v7 = vpop.f32.mrb[25].mxu0 }
0x17c3   : > { %v2657_v51 = vmax.f32 %v2644_v17, 0.0 }
0x17c4   : > { %v2648_v52 = vpop.f32.mrb[26].mxu0 }
0x17c5   : > { %v2663_v53 = vmul.f32 %v2660_v3, %v2657_v51  ;;  %v2649_v54 = vadd.f32 %v2648_v52, %v2562_v50  ;;  %v3143_v55 = vpop.f32.mrb[27].mxu0 }
0x17c7   : > { %2666 = vst [vmem:[%s382_s27] sm:$0xff] %v2663_v53  ;;  %v2658_v57 = vmax.f32 %v2649_v54, 0.0 }
0x17c8   : > { %v2653_v14 = vpop.f32.mrb[28].mxu0 }
0x17c9   : > { %v2664_v60 = vmul.f32 %v2661_v56, %v2658_v57  ;;  %v3146_v36 = vpop.f32.mrb[29].mxu0  ;;  %v2654_v61 = vadd.f32 %v2653_v14, %v2566_v6 }
0x17cb   : > { %2667 = vst [vmem:[%s382_s27 + $0x8] sm:$0xff] %v2664_v60  ;;  %v2659_v2 = vmax.f32 %v2654_v61, 0.0 }
0x17cd   : > { %v2665_v8 = vmul.f32 %v2662_v62, %v2659_v2 }
0x17cf   : > { %2668 = vst [vmem:[%s382_s27 + $0x10] sm:$0xff] %v2665_v8 }
0x17d0   : > { %3549 = shalt.err (!%p3546_p3)
}
0x17d1   : > { %s3550_s12 = scalar_lea.hbm %s4222_s25, 384  ;;  %s3554_s11 = scalar_lea.hbm %s4277_s10, 768 }
0x17d2   : > { %p3551_p4 = scmp.ne.s32.totalorder %s4222_s25, %s3550_s12  ;;  %p3555_p9 = scmp.lt.u32.totalorder %s4222_s25, %s4277_s10 }
0x17d3   : > { %p3556_p10 = scmp.lt.u32.totalorder %s3554_s11, %s3550_s12  ;;  %p3558_p12 = scmp.lt.u32.totalorder %s3550_s12, %s4222_s25 }
0x17d4   : > { %p3552_p7 = pnand %p3551_p4, %p3736_p5 }
0x17d5   : > { %p3557_p11 = por %p3556_p10, %p3555_p9 }
0x17d6   : > { %p3553_p8 = pneg %p3552_p7 }
0x17d7   : > { %p3559_p13 = por %p3558_p12, %p3557_p11 }
0x17d9   : > { %p3560_p0 = pnand %p3559_p13, %p3553_p8 }
0x17db   : > { %3563 = shalt.err (!%p3560_p0)
}
0x17dc   : > { %s3641_s0 = smov 128   ;;  %s3642_s28 = smov 8  }
0x17dd   : > { %3340 = dma.vmem_to_hbm [thread:$0]  (%p3736_p5), %s4217_s20, 384, %s4222_s25, %s4226_s17, %s3641_s0, %s3641_s0, %s3642_s28  }
0x17de PF: > { %p3346_p1 = scmp.ge.s32.totalorder %s3598_s16, 2  ;;  %s2698_s21 = sand.u32 1, %s3586_s13  }
0x17df   : > { %s2699_s29 = scalar_lea.sflag [#allocation3], %s2698_s21 }
0x17e0   : > { %p3343_p2 = pnand %p3346_p1, %p3740_p6 }
0x17e2   : > { %3581 = dma.done.wait (!%p3343_p2), %s2699_s29, 384  }
0x17e3   : > { %3583 = vsyncadd (!%p3343_p2), %s2699_s29, 4294966912  ;;  %p20_p3 = scmp.ge.s32.totalorder %s3723_s19, 4   ;;  %s4303_s13 = smov %s3590_s14 }
0x17e4   : > { %s4304_s14 = smov %s3594_s15  ;;  %s4305_s15 = smov %s3734_s22 }
0x17e5   : > { %s4306_s16 = smov %s3723_s19  ;;  %22 = sbr.rel (!%p20_p3) target bundleno = 5 (0x5), region = 110 }
0x17ec   :  { %2704 = vsyncpa [#allocation3], 1 }
0x17ed   :  { %2706 = vsyncpa [#allocation3 + $0x1], 1 }

</bundles_post_ra>
